<compile_context>
chip_gen: v6e
topology: v6e:2x2x1
jax: 0.10.0
libtpu: 0.0.40
codegen_flags: <defaults>
</compile_context>

<pallas_src>
import math
import functools

import jax
import jax.numpy as jnp
from jax.experimental import pallas as pl
from jax.experimental.pallas import tpu as pltpu

DTYPE = jnp.float32
WDTYPE = jnp.bfloat16        # storage dtype of the large matmul weights
NHEAD = 4
FF_DIM = 2048                # nn.TransformerEncoderLayer default dim_feedforward
REG1 = 2048
REG2 = 1024
LN_EPS = 1e-5
NUM_LAYERS = 6
VMEM_LIMIT = 32 * 1024 * 1024


# --------------------------------------------------------------------------- #
# ONE fused pallas_call: 6-layer encoder + folded regression epilogue
# --------------------------------------------------------------------------- #

def fused_forward(xf, amask, p, C, b_final, *, out_scale, nhead=NHEAD):
    """xf    : (T, D) tokens after positional encoding (T = S*B, t = s*B + b)
       amask : (T, T) additive mask (0 same-batch, -1e30 cross-batch)
       C     : (N, T) folded view(-1,time_len)+Linear(time_len,1) combination
       b_final : (1, 1) folded final bias."""
    T, D = xf.shape
    H = nhead
    Dh = D // H
    L = p["w_in"].shape[0]
    FF = p["w1"].shape[-1]
    N = C.shape[0]

    def layer_norm(h, g, b):
        mu = jnp.mean(h, axis=-1, keepdims=True)
        var = jnp.mean(jnp.square(h - mu), axis=-1, keepdims=True)
        return (h - mu) * jax.lax.rsqrt(var + LN_EPS) * g + b

    def kernel(x_ref, am_ref, w_in_ref, vec_ref, w_out_ref, w1_ref, b1_ref,
               w2_ref, wt_ref, c_ref, bf_ref, o_ref, acc_ref):
        l = pl.program_id(0)

        @pl.when(l == 0)
        def _():
            acc_ref[...] = x_ref[...]          # activation carry (VMEM scratch)

        h = acc_ref[...]                       # (T, D) activation entering layer l
        vec = vec_ref[...]                     # (9, D): bq,bk,bv,bo,g1,b1,b2,g2,b2
        am = am_ref[...]                       # (T, T) additive same-batch mask

        # ---- fused QKV projection (1/sqrt(Dh) pre-folded into q cols) ----
        qkv = jnp.dot(h.astype(WDTYPE), w_in_ref[...],
                      preferred_element_type=jnp.float32)          # (T, 3D)
        q = qkv[:, :D] + vec[0:1]
        k = qkv[:, D:2 * D] + vec[1:2]
        v = qkv[:, 2 * D:] + vec[2:3]

        # ---- multi-head attention via in-VMEM head-selector masks ----
        lane = jax.lax.broadcasted_iota(jnp.int32, (T, D), 1)
        attn = jnp.zeros((T, D), jnp.float32)
        for hd in range(H):                    # static unroll, full-width ops
            mh = jnp.where((lane >= hd * Dh) & (lane < (hd + 1) * Dh), 1.0, 0.0)
            s = jax.lax.dot_general(q * mh, k, (((1,), (1,)), ((), ())),
                                    preferred_element_type=jnp.float32)  # (T,T)
            s = s + am                         # block cross-batch attention
            m = jnp.max(s, axis=-1, keepdims=True)
            pexp = jnp.exp(s - m)              # masked entries underflow to 0
            pnorm = pexp * pl.reciprocal(
                jnp.sum(pexp, axis=-1, keepdims=True), approx=True)
            attn = attn + jnp.dot(pnorm, v,
                                  preferred_element_type=jnp.float32) * mh

        attn = jnp.dot(attn.astype(WDTYPE), w_out_ref[...],
                       preferred_element_type=jnp.float32) + vec[3:4]
        h1 = layer_norm(h + attn, vec[4:5], vec[5:6])        # post-norm

        # ---- feed-forward (bf16 weights, f32 accumulation) ----
        f = jnp.dot(h1.astype(WDTYPE), w1_ref[...],
                    preferred_element_type=jnp.float32) + b1_ref[...]
        f = jnp.maximum(f, 0.0)
        f = jnp.dot(f.astype(WDTYPE), w2_ref[...],
                    preferred_element_type=jnp.float32) + vec[6:7]
        h2 = layer_norm(h1 + f, vec[7:8], vec[8:9])

        acc_ref[...] = h2

        # ---- fused regression epilogue on the last layer ----
        @pl.when(l == L - 1)
        def _():
            r = jnp.dot(h2, wt_ref[...],
                        preferred_element_type=jnp.float32)          # (T, 1)
            y = jnp.dot(c_ref[...], r,
                        preferred_element_type=jnp.float32) + bf_ref[...]
            o_ref[...] = (jax.nn.sigmoid(y) * out_scale).astype(o_ref.dtype)

    def resident(shape):                       # constant block index -> loaded once
        nd = len(shape)
        return pl.BlockSpec(shape, lambda l, nd=nd: (0,) * nd)

    def per_layer(trailing):                   # leading layer dim squeezed away
        nz = len(trailing)
        return pl.BlockSpec((None,) + trailing,
                            lambda l, nz=nz: (l,) + (0,) * nz)

    in_specs = [
        resident((T, D)),                      # x (consumed only at layer 0)
        resident((T, T)),                      # additive same-batch mask
        per_layer((D, 3 * D)),                 # fused QKV weight (bf16)
        per_layer((9, D)),                     # packed per-layer vectors (f32)
        per_layer((D, D)),                     # out_proj weight (bf16)
        per_layer((D, FF)),                    # lin1 weight (bf16)
        per_layer((1, FF)),                    # lin1 bias
        per_layer((FF, D)),                    # lin2 weight (bf16)
        resident((D, 1)),                      # folded reg1@reg2@reg3 (f32)
        resident((N, T)),                      # folded view+Linear combination
        resident((1, 1)),                      # folded final bias
    ]

    return pl.pallas_call(
        kernel,
        out_shape=jax.ShapeDtypeStruct((N, 1), DTYPE),
        grid=(L,),
        in_specs=in_specs,
        out_specs=pl.BlockSpec((N, 1), lambda l: (0, 0)),
        scratch_shapes=[pltpu.VMEM((T, D), jnp.float32)],
        compiler_params=pltpu.CompilerParams(
            dimension_semantics=("arbitrary",),     # layer axis is sequential
            vmem_limit_bytes=VMEM_LIMIT),
    )(xf, amask, p["w_in"], p["vec"], p["w_out"], p["w1"], p["b1"], p["w2"],
      p["w_tail"], C, b_final)


# --------------------------- parameters (JAX side) -------------------------- #

def make_positional_encoding(d_model, max_len=512):
    position = jnp.arange(max_len, dtype=DTYPE)[:, None]
    div_term = jnp.exp(jnp.arange(0, d_model, 2, dtype=DTYPE)
                       * (-math.log(10000.0) / d_model))
    ang = position * div_term
    # interleave: pe[:, 0::2] = sin, pe[:, 1::2] = cos
    pe = jnp.stack([jnp.sin(ang), jnp.cos(ang)], axis=-1).reshape(max_len, d_model)
    return pe[:, None, :]        # (max_len, 1, d_model)


def _uniform(key, shape, fan_in):
    bound = 1.0 / math.sqrt(fan_in)
    return jax.random.uniform(key, shape, DTYPE, -bound, bound)


def init_params(key, data_len, time_len, num_layers=NUM_LAYERS):
    """Raw PyTorch-layout parameters (already transposed for right-matmul)."""
    D = data_len
    params = {"pe": make_positional_encoding(D), "layers": []}
    for _ in range(num_layers):
        key, *ks = jax.random.split(key, 9)
        params["layers"].append({
            "in_proj_w_t": _uniform(ks[0], (D, 3 * D), D),
            "in_proj_b":   _uniform(ks[1], (3 * D,), D),
            "out_proj_w_t": _uniform(ks[2], (D, D), D),
            "out_proj_b":   _uniform(ks[3], (D,), D),
            "lin1_w_t": _uniform(ks[4], (D, FF_DIM), D),
            "lin1_b":   _uniform(ks[5], (FF_DIM,), D),
            "lin2_w_t": _uniform(ks[6], (FF_DIM, D), FF_DIM),
            "lin2_b":   _uniform(ks[7], (D,), FF_DIM),
            "ln1_g": jnp.ones((D,), DTYPE), "ln1_b": jnp.zeros((D,), DTYPE),
            "ln2_g": jnp.ones((D,), DTYPE), "ln2_b": jnp.zeros((D,), DTYPE),
        })
    key, *ks = jax.random.split(key, 9)
    params.update({
        "reg1_w_t": _uniform(ks[0], (D, REG1), D),
        "reg1_b":   _uniform(ks[1], (REG1,), D),
        "reg2_w_t": _uniform(ks[2], (REG1, REG2), REG1),
        "reg2_b":   _uniform(ks[3], (REG2,), REG1),
        "reg3_w_t": _uniform(ks[4], (REG2, 1), REG2),
        "reg3_b":   _uniform(ks[5], (1,), REG2),
        "lin_w_t":  _uniform(ks[6], (time_len, 1), time_len),
        "lin_b":    _uniform(ks[7], (1,), time_len),
    })
    return params


def prepare_params(raw, nhead=NHEAD):
    """Repack into fused-kernel layout:
       - per-layer weights stacked on a leading layer axis,
       - attention scale folded into the q columns of the fused QKV weight,
       - the 9 tiny per-layer vectors packed into one (L, 9, D) array,
       - big matmul weights cast to bf16,
       - the purely-affine regression tail folded to a (D, 1) vector + scalar."""
    layers = raw["layers"]
    D = layers[0]["out_proj_w_t"].shape[0]
    Dh = D // nhead
    scale = 1.0 / math.sqrt(Dh)

    def stack(fn, dtype=DTYPE):
        return jnp.stack([fn(lp) for lp in layers], axis=0).astype(dtype)

    def fold_qkv_w(lp):
        w = lp["in_proj_w_t"]                          # (D, 3D)
        return jnp.concatenate([w[:, :D] * scale, w[:, D:]], axis=1)

    def pack_vec(lp):
        b = lp["in_proj_b"]
        return jnp.stack([
            b[:D] * scale, b[D:2 * D], b[2 * D:],      # bq (scaled), bk, bv
            lp["out_proj_b"],
            lp["ln1_g"], lp["ln1_b"],
            lp["lin2_b"],
            lp["ln2_g"], lp["ln2_b"],
        ], axis=0)                                     # (9, D)

    # Fold the affine regression tail reg1 -> reg2 -> reg3 (no activations
    # between them in the PyTorch forward) into one (D, 1) vector + scalar.
    w_tail = raw["reg1_w_t"] @ raw["reg2_w_t"] @ raw["reg3_w_t"]          # (D, 1)
    b_tail = (raw["reg1_b"] @ raw["reg2_w_t"] @ raw["reg3_w_t"]
              + raw["reg2_b"] @ raw["reg3_w_t"] + raw["reg3_b"])          # (1,)

    return {
        "pe": raw["pe"],
        "w_in":  stack(fold_qkv_w, WDTYPE),            # (L, D, 3D) bf16
        "vec":   stack(pack_vec),                      # (L, 9, D)  f32
        "w_out": stack(lambda lp: lp["out_proj_w_t"], WDTYPE),   # (L, D, D) bf16
        "w1":    stack(lambda lp: lp["lin1_w_t"], WDTYPE),       # (L, D, FF) bf16
        "b1":    stack(lambda lp: lp["lin1_b"].reshape(1, FF_DIM)),
        "w2":    stack(lambda lp: lp["lin2_w_t"], WDTYPE),       # (L, FF, D) bf16
        "w_tail": w_tail,                              # (D, 1) f32
        "b_tail": b_tail,                              # (1,)   f32
        "lin_w_t": raw["lin_w_t"],                     # (time_len, 1) f32
        "lin_b":   raw["lin_b"],                       # (1,)
    }


# ---------------------------------- forward --------------------------------- #

def multimodal_transformer_forward(p, x, *, time_len, dataset="avec17",
                                   nhead=NHEAD):
    """x: (S, B, data_len) — PyTorch seq-first transformer convention."""
    S, B, D = x.shape
    T = S * B

    # PositionalEncoding (dropout p=0.0 -> identity)
    x = x + p["pe"][:S]
    xf = x.reshape(T, D)                               # token t = s*B + b

    # Additive same-batch attention mask for the flattened (seq-major) layout.
    # Tiny (T,T) constant — resident block, DMA'd once for the whole call.
    tok = jnp.arange(T, dtype=jnp.int32)
    amask = jnp.where((tok[:, None] % B) == (tok[None, :] % B),
                      0.0, -1e30).astype(DTYPE)

    # Fold `view(-1, 1, time_len); Linear(time_len, 1)` into an (N, T)
    # combination matrix over the per-token folded tail outputs.  Row order of
    # xf matches PyTorch's row-major .view on the seq-first (S, B, 1) tensor.
    N = T // time_len
    lin_row = p["lin_w_t"].reshape(1, time_len)
    C = jnp.kron(jnp.eye(N, dtype=DTYPE), lin_row)                       # (N, T)
    b_final = (p["b_tail"][0] * jnp.sum(p["lin_w_t"])
               + p["lin_b"][0]).reshape(1, 1)

    out_scale = 23.0 if dataset == "avec17" else 63.0
    y = fused_forward(xf, amask, p, C, b_final,
                      out_scale=out_scale, nhead=nhead)   # single pallas_call
    return jnp.squeeze(y)                              # matches x.squeeze()


# ----------------------------------- main ------------------------------------ #

if __name__ == "__main__":
    DATA_LEN = 32    # d_model (divisible by nhead=4)
    TIME_LEN = 8     # sequence / time length
    BATCH = 2

    key = jax.random.PRNGKey(0)
    k_x, k_p = jax.random.split(key)
    x = jax.random.normal(k_x, (TIME_LEN, BATCH, DATA_LEN), DTYPE)   # (S, B, D)
    raw = init_params(k_p, DATA_LEN, TIME_LEN)
    params = prepare_params(raw)

    fwd = jax.jit(functools.partial(multimodal_transformer_forward,
                                    time_len=TIME_LEN, dataset="avec17"))
    y = fwd(params, x)
    y = jax.block_until_ready(y)

    assert y.shape == (BATCH,), y.shape
    assert bool(jnp.all(jnp.isfinite(y)))
    assert bool(jnp.all((y >= 0.0) & (y <= 23.0)))
    print("KERNEL_OK")
</pallas_src>

<mosaic_0001>
module attributes {stable_mosaic.version = 11 : i64} {
  func.func @kernel(%arg0: i32, %arg1: memref<16x32xf32, #tpu.memory_space<vmem>>, %arg2: memref<16x16xf32, #tpu.memory_space<vmem>>, %arg3: memref<1x32x96xbf16, #tpu.memory_space<vmem>>, %arg4: memref<1x9x32xf32, #tpu.memory_space<vmem>>, %arg5: memref<1x32x32xbf16, #tpu.memory_space<vmem>>, %arg6: memref<1x32x2048xbf16, #tpu.memory_space<vmem>>, %arg7: memref<1x1x2048xf32, #tpu.memory_space<vmem>>, %arg8: memref<1x2048x32xbf16, #tpu.memory_space<vmem>>, %arg9: memref<32x1xf32, #tpu.memory_space<vmem>>, %arg10: memref<2x16xf32, #tpu.memory_space<vmem>>, %arg11: memref<1x1xf32, #tpu.memory_space<vmem>>, %arg12: memref<2x1xf32, #tpu.memory_space<vmem>>, %arg13: memref<16x32xf32, #tpu.memory_space<vmem>>) attributes {dimension_semantics = [#tpu.dimension_semantics<arbitrary>], iteration_bounds = array<i64: 6>, scalar_prefetch = 0 : i64, scratch_operands = 1 : i64, tpu.core_type = #tpu.core_type<tc>, window_params = [{pipeline_mode = #tpu.pipeline_mode<synchronous>, transform_indices = @transform_0, window_bounds = array<i64: 16, 32>}, {pipeline_mode = #tpu.pipeline_mode<synchronous>, transform_indices = @transform_1, window_bounds = array<i64: 16, 16>}, {transform_indices = @transform_2, window_bounds = array<i64: 1, 32, 96>}, {transform_indices = @transform_3, window_bounds = array<i64: 1, 9, 32>}, {transform_indices = @transform_4, window_bounds = array<i64: 1, 32, 32>}, {transform_indices = @transform_5, window_bounds = array<i64: 1, 32, 2048>}, {transform_indices = @transform_6, window_bounds = array<i64: 1, 1, 2048>}, {transform_indices = @transform_7, window_bounds = array<i64: 1, 2048, 32>}, {pipeline_mode = #tpu.pipeline_mode<synchronous>, transform_indices = @transform_8, window_bounds = array<i64: 32, 1>}, {pipeline_mode = #tpu.pipeline_mode<synchronous>, transform_indices = @transform_9, window_bounds = array<i64: 2, 16>}, {pipeline_mode = #tpu.pipeline_mode<synchronous>, transform_indices = @transform_10, window_bounds = array<i64: 1, 1>}, {pipeline_mode = #tpu.pipeline_mode<synchronous>, transform_indices = @transform_11, window_bounds = array<i64: 2, 1>}]} {
    %c0_i32 = arith.constant 0 : i32
    %0 = arith.cmpi eq, %arg0, %c0_i32 : i32
    %1 = arith.extui %0 : i1 to i32
    %c0_i32_0 = arith.constant 0 : i32
    %2 = arith.cmpi ne, %1, %c0_i32_0 : i32
    scf.if %2 {
      %c0_68 = arith.constant 0 : index
      %c0_69 = arith.constant 0 : index
      %199 = vector.load %arg1[%c0_68, %c0_69] : memref<16x32xf32, #tpu.memory_space<vmem>>, vector<16x32xf32>
      %c0_70 = arith.constant 0 : index
      %c0_71 = arith.constant 0 : index
      %200 = vector.load %arg13[%c0_70, %c0_71] : memref<16x32xf32, #tpu.memory_space<vmem>>, vector<16x32xf32>
      tpu.vector_store %arg13[%c0_70, %c0_71], %199 {strides = array<i32>} : memref<16x32xf32, #tpu.memory_space<vmem>>, vector<16x32xf32>,
    } else {
    }
    %c0 = arith.constant 0 : index
    %c0_1 = arith.constant 0 : index
    %3 = vector.load %arg13[%c0, %c0_1] : memref<16x32xf32, #tpu.memory_space<vmem>>, vector<16x32xf32>
    %c0_2 = arith.constant 0 : index
    %c0_3 = arith.constant 0 : index
    %c0_4 = arith.constant 0 : index
    %4 = vector.load %arg4[%c0_2, %c0_3, %c0_4] : memref<1x9x32xf32, #tpu.memory_space<vmem>>, vector<1x9x32xf32>
    %5 = vector.shape_cast %4 : vector<1x9x32xf32> to vector<9x32xf32>
    %c0_5 = arith.constant 0 : index
    %c0_6 = arith.constant 0 : index
    %6 = vector.load %arg2[%c0_5, %c0_6] : memref<16x16xf32, #tpu.memory_space<vmem>>, vector<16x16xf32>
    %7 = arith.truncf %3 : vector<16x32xf32> to vector<16x32xbf16>
    %c0_7 = arith.constant 0 : index
    %c0_8 = arith.constant 0 : index
    %c0_9 = arith.constant 0 : index
    %8 = vector.load %arg3[%c0_7, %c0_8, %c0_9] : memref<1x32x96xbf16, #tpu.memory_space<vmem>>, vector<1x32x96xbf16>
    %9 = vector.shape_cast %8 : vector<1x32x96xbf16> to vector<32x96xbf16>
    %cst = arith.constant dense<0.000000e+00> : vector<16x96xf32>
    %10 = tpu.matmul %7, %9, %cst {dimension_numbers = #tpu.dot_dimension_numbers<[1], [0], [0], [1], [0, 0, 1, 1], [], []>} : vector<16x32xbf16>, vector<32x96xbf16>, vector<16x96xf32> -> vector<16x96xf32>
    %11 = vector.extract_strided_slice %10 {offsets = [0, 0], sizes = [16, 32], strides = [1, 1]} : vector<16x96xf32> to vector<16x32xf32>
    %12 = vector.extract_strided_slice %5 {offsets = [0, 0], sizes = [1, 32], strides = [1, 1]} : vector<9x32xf32> to vector<1x32xf32>
    %13 = vector.broadcast %12 : vector<1x32xf32> to vector<16x32xf32>
    %14 = arith.addf %11, %13 : vector<16x32xf32>
    %15 = vector.extract_strided_slice %10 {offsets = [0, 32], sizes = [16, 32], strides = [1, 1]} : vector<16x96xf32> to vector<16x32xf32>
    %16 = vector.extract_strided_slice %5 {offsets = [1, 0], sizes = [1, 32], strides = [1, 1]} : vector<9x32xf32> to vector<1x32xf32>
    %17 = vector.broadcast %16 : vector<1x32xf32> to vector<16x32xf32>
    %18 = arith.addf %15, %17 : vector<16x32xf32>
    %19 = vector.extract_strided_slice %10 {offsets = [0, 64], sizes = [16, 32], strides = [1, 1]} : vector<16x96xf32> to vector<16x32xf32>
    %20 = vector.extract_strided_slice %5 {offsets = [2, 0], sizes = [1, 32], strides = [1, 1]} : vector<9x32xf32> to vector<1x32xf32>
    %21 = vector.broadcast %20 : vector<1x32xf32> to vector<16x32xf32>
    %22 = arith.addf %19, %21 : vector<16x32xf32>
    %23 = tpu.iota {dimensions = array<i32: 1>} : vector<16x32xi32>
    %cst_10 = arith.constant 0.000000e+00 : f32
    %24 = vector.broadcast %cst_10 : f32 to vector<16x32xf32>
    %c0_i32_11 = arith.constant 0 : i32
    %25 = vector.broadcast %c0_i32_11 : i32 to vector<16x32xi32>
    %26 = arith.cmpi sge, %23, %25 : vector<16x32xi32>
    %c8_i32 = arith.constant 8 : i32
    %27 = vector.broadcast %c8_i32 : i32 to vector<16x32xi32>
    %28 = arith.cmpi slt, %23, %27 : vector<16x32xi32>
    %29 = arith.andi %26, %28 : vector<16x32xi1>
    %cst_12 = arith.constant 1.000000e+00 : f32
    %cst_13 = arith.constant 0.000000e+00 : f32
    %30 = vector.broadcast %cst_12 : f32 to vector<16x32xf32>
    %31 = vector.broadcast %cst_13 : f32 to vector<16x32xf32>
    %32 = arith.select %29, %30, %31 : vector<16x32xi1>, vector<16x32xf32>
    %33 = arith.mulf %14, %32 : vector<16x32xf32>
    %cst_14 = arith.constant dense<0.000000e+00> : vector<16x16xf32>
    %34 = tpu.matmul %33, %18, %cst_14 {dimension_numbers = #tpu.dot_dimension_numbers<[1], [1], [0], [0], [0, 0, 1, 0], [], []>} : vector<16x32xf32>, vector<16x32xf32>, vector<16x16xf32> -> vector<16x16xf32>
    %35 = arith.addf %34, %6 : vector<16x16xf32>
    %cst_15 = arith.constant dense<0xFF800000> : vector<16xf32>
    %36 = vector.multi_reduction <maximumf>, %35, %cst_15 [1] : vector<16x16xf32> to vector<16xf32>
    %37 = vector.shape_cast %36 : vector<16xf32> to vector<16x1xf32>
    %38 = vector.broadcast %37 : vector<16x1xf32> to vector<16x16xf32>
    %39 = arith.subf %35, %38 : vector<16x16xf32>
    %40 = math.exp %39 : vector<16x16xf32>
    %cst_16 = arith.constant dense<0.000000e+00> : vector<16xf32>
    %41 = vector.multi_reduction <add>, %40, %cst_16 [1] : vector<16x16xf32> to vector<16xf32>
    %42 = vector.shape_cast %41 : vector<16xf32> to vector<16x1xf32>
    %43 = tpu.reciprocal %42 {approx = true} : vector<16x1xf32> -> vector<16x1xf32>
    %44 = vector.broadcast %43 : vector<16x1xf32> to vector<16x16xf32>
    %45 = arith.mulf %40, %44 : vector<16x16xf32>
    %cst_17 = arith.constant dense<0.000000e+00> : vector<16x32xf32>
    %46 = tpu.matmul %45, %22, %cst_17 {dimension_numbers = #tpu.dot_dimension_numbers<[1], [0], [0], [1], [0, 0, 1, 1], [], []>} : vector<16x16xf32>, vector<16x32xf32>, vector<16x32xf32> -> vector<16x32xf32>
    %47 = arith.mulf %46, %32 : vector<16x32xf32>
    %48 = arith.addf %24, %47 : vector<16x32xf32>
    %c8_i32_18 = arith.constant 8 : i32
    %49 = vector.broadcast %c8_i32_18 : i32 to vector<16x32xi32>
    %50 = arith.cmpi sge, %23, %49 : vector<16x32xi32>
    %c16_i32 = arith.constant 16 : i32
    %51 = vector.broadcast %c16_i32 : i32 to vector<16x32xi32>
    %52 = arith.cmpi slt, %23, %51 : vector<16x32xi32>
    %53 = arith.andi %50, %52 : vector<16x32xi1>
    %cst_19 = arith.constant 1.000000e+00 : f32
    %cst_20 = arith.constant 0.000000e+00 : f32
    %54 = vector.broadcast %cst_19 : f32 to vector<16x32xf32>
    %55 = vector.broadcast %cst_20 : f32 to vector<16x32xf32>
    %56 = arith.select %53, %54, %55 : vector<16x32xi1>, vector<16x32xf32>
    %57 = arith.mulf %14, %56 : vector<16x32xf32>
    %cst_21 = arith.constant dense<0.000000e+00> : vector<16x16xf32>
    %58 = tpu.matmul %57, %18, %cst_21 {dimension_numbers = #tpu.dot_dimension_numbers<[1], [1], [0], [0], [0, 0, 1, 0], [], []>} : vector<16x32xf32>, vector<16x32xf32>, vector<16x16xf32> -> vector<16x16xf32>
    %59 = arith.addf %58, %6 : vector<16x16xf32>
    %cst_22 = arith.constant dense<0xFF800000> : vector<16xf32>
    %60 = vector.multi_reduction <maximumf>, %59, %cst_22 [1] : vector<16x16xf32> to vector<16xf32>
    %61 = vector.shape_cast %60 : vector<16xf32> to vector<16x1xf32>
    %62 = vector.broadcast %61 : vector<16x1xf32> to vector<16x16xf32>
    %63 = arith.subf %59, %62 : vector<16x16xf32>
    %64 = math.exp %63 : vector<16x16xf32>
    %cst_23 = arith.constant dense<0.000000e+00> : vector<16xf32>
    %65 = vector.multi_reduction <add>, %64, %cst_23 [1] : vector<16x16xf32> to vector<16xf32>
    %66 = vector.shape_cast %65 : vector<16xf32> to vector<16x1xf32>
    %67 = tpu.reciprocal %66 {approx = true} : vector<16x1xf32> -> vector<16x1xf32>
    %68 = vector.broadcast %67 : vector<16x1xf32> to vector<16x16xf32>
    %69 = arith.mulf %64, %68 : vector<16x16xf32>
    %cst_24 = arith.constant dense<0.000000e+00> : vector<16x32xf32>
    %70 = tpu.matmul %69, %22, %cst_24 {dimension_numbers = #tpu.dot_dimension_numbers<[1], [0], [0], [1], [0, 0, 1, 1], [], []>} : vector<16x16xf32>, vector<16x32xf32>, vector<16x32xf32> -> vector<16x32xf32>
    %71 = arith.mulf %70, %56 : vector<16x32xf32>
    %72 = arith.addf %48, %71 : vector<16x32xf32>
    %c16_i32_25 = arith.constant 16 : i32
    %73 = vector.broadcast %c16_i32_25 : i32 to vector<16x32xi32>
    %74 = arith.cmpi sge, %23, %73 : vector<16x32xi32>
    %c24_i32 = arith.constant 24 : i32
    %75 = vector.broadcast %c24_i32 : i32 to vector<16x32xi32>
    %76 = arith.cmpi slt, %23, %75 : vector<16x32xi32>
    %77 = arith.andi %74, %76 : vector<16x32xi1>
    %cst_26 = arith.constant 1.000000e+00 : f32
    %cst_27 = arith.constant 0.000000e+00 : f32
    %78 = vector.broadcast %cst_26 : f32 to vector<16x32xf32>
    %79 = vector.broadcast %cst_27 : f32 to vector<16x32xf32>
    %80 = arith.select %77, %78, %79 : vector<16x32xi1>, vector<16x32xf32>
    %81 = arith.mulf %14, %80 : vector<16x32xf32>
    %cst_28 = arith.constant dense<0.000000e+00> : vector<16x16xf32>
    %82 = tpu.matmul %81, %18, %cst_28 {dimension_numbers = #tpu.dot_dimension_numbers<[1], [1], [0], [0], [0, 0, 1, 0], [], []>} : vector<16x32xf32>, vector<16x32xf32>, vector<16x16xf32> -> vector<16x16xf32>
    %83 = arith.addf %82, %6 : vector<16x16xf32>
    %cst_29 = arith.constant dense<0xFF800000> : vector<16xf32>
    %84 = vector.multi_reduction <maximumf>, %83, %cst_29 [1] : vector<16x16xf32> to vector<16xf32>
    %85 = vector.shape_cast %84 : vector<16xf32> to vector<16x1xf32>
    %86 = vector.broadcast %85 : vector<16x1xf32> to vector<16x16xf32>
    %87 = arith.subf %83, %86 : vector<16x16xf32>
    %88 = math.exp %87 : vector<16x16xf32>
    %cst_30 = arith.constant dense<0.000000e+00> : vector<16xf32>
    %89 = vector.multi_reduction <add>, %88, %cst_30 [1] : vector<16x16xf32> to vector<16xf32>
    %90 = vector.shape_cast %89 : vector<16xf32> to vector<16x1xf32>
    %91 = tpu.reciprocal %90 {approx = true} : vector<16x1xf32> -> vector<16x1xf32>
    %92 = vector.broadcast %91 : vector<16x1xf32> to vector<16x16xf32>
    %93 = arith.mulf %88, %92 : vector<16x16xf32>
    %cst_31 = arith.constant dense<0.000000e+00> : vector<16x32xf32>
    %94 = tpu.matmul %93, %22, %cst_31 {dimension_numbers = #tpu.dot_dimension_numbers<[1], [0], [0], [1], [0, 0, 1, 1], [], []>} : vector<16x16xf32>, vector<16x32xf32>, vector<16x32xf32> -> vector<16x32xf32>
    %95 = arith.mulf %94, %80 : vector<16x32xf32>
    %96 = arith.addf %72, %95 : vector<16x32xf32>
    %c24_i32_32 = arith.constant 24 : i32
    %97 = vector.broadcast %c24_i32_32 : i32 to vector<16x32xi32>
    %98 = arith.cmpi sge, %23, %97 : vector<16x32xi32>
    %c32_i32 = arith.constant 32 : i32
    %99 = vector.broadcast %c32_i32 : i32 to vector<16x32xi32>
    %100 = arith.cmpi slt, %23, %99 : vector<16x32xi32>
    %101 = arith.andi %98, %100 : vector<16x32xi1>
    %cst_33 = arith.constant 1.000000e+00 : f32
    %cst_34 = arith.constant 0.000000e+00 : f32
    %102 = vector.broadcast %cst_33 : f32 to vector<16x32xf32>
    %103 = vector.broadcast %cst_34 : f32 to vector<16x32xf32>
    %104 = arith.select %101, %102, %103 : vector<16x32xi1>, vector<16x32xf32>
    %105 = arith.mulf %14, %104 : vector<16x32xf32>
    %cst_35 = arith.constant dense<0.000000e+00> : vector<16x16xf32>
    %106 = tpu.matmul %105, %18, %cst_35 {dimension_numbers = #tpu.dot_dimension_numbers<[1], [1], [0], [0], [0, 0, 1, 0], [], []>} : vector<16x32xf32>, vector<16x32xf32>, vector<16x16xf32> -> vector<16x16xf32>
    %107 = arith.addf %106, %6 : vector<16x16xf32>
    %cst_36 = arith.constant dense<0xFF800000> : vector<16xf32>
    %108 = vector.multi_reduction <maximumf>, %107, %cst_36 [1] : vector<16x16xf32> to vector<16xf32>
    %109 = vector.shape_cast %108 : vector<16xf32> to vector<16x1xf32>
    %110 = vector.broadcast %109 : vector<16x1xf32> to vector<16x16xf32>
    %111 = arith.subf %107, %110 : vector<16x16xf32>
    %112 = math.exp %111 : vector<16x16xf32>
    %cst_37 = arith.constant dense<0.000000e+00> : vector<16xf32>
    %113 = vector.multi_reduction <add>, %112, %cst_37 [1] : vector<16x16xf32> to vector<16xf32>
    %114 = vector.shape_cast %113 : vector<16xf32> to vector<16x1xf32>
    %115 = tpu.reciprocal %114 {approx = true} : vector<16x1xf32> -> vector<16x1xf32>
    %116 = vector.broadcast %115 : vector<16x1xf32> to vector<16x16xf32>
    %117 = arith.mulf %112, %116 : vector<16x16xf32>
    %cst_38 = arith.constant dense<0.000000e+00> : vector<16x32xf32>
    %118 = tpu.matmul %117, %22, %cst_38 {dimension_numbers = #tpu.dot_dimension_numbers<[1], [0], [0], [1], [0, 0, 1, 1], [], []>} : vector<16x16xf32>, vector<16x32xf32>, vector<16x32xf32> -> vector<16x32xf32>
    %119 = arith.mulf %118, %104 : vector<16x32xf32>
    %120 = arith.addf %96, %119 : vector<16x32xf32>
    %121 = arith.truncf %120 : vector<16x32xf32> to vector<16x32xbf16>
    %c0_39 = arith.constant 0 : index
    %c0_40 = arith.constant 0 : index
    %c0_41 = arith.constant 0 : index
    %122 = vector.load %arg5[%c0_39, %c0_40, %c0_41] : memref<1x32x32xbf16, #tpu.memory_space<vmem>>, vector<1x32x32xbf16>
    %123 = vector.shape_cast %122 : vector<1x32x32xbf16> to vector<32x32xbf16>
    %cst_42 = arith.constant dense<0.000000e+00> : vector<16x32xf32>
    %124 = tpu.matmul %121, %123, %cst_42 {dimension_numbers = #tpu.dot_dimension_numbers<[1], [0], [0], [1], [0, 0, 1, 1], [], []>} : vector<16x32xbf16>, vector<32x32xbf16>, vector<16x32xf32> -> vector<16x32xf32>
    %125 = vector.extract_strided_slice %5 {offsets = [3, 0], sizes = [1, 32], strides = [1, 1]} : vector<9x32xf32> to vector<1x32xf32>
    %126 = vector.broadcast %125 : vector<1x32xf32> to vector<16x32xf32>
    %127 = arith.addf %124, %126 : vector<16x32xf32>
    %128 = arith.addf %3, %127 : vector<16x32xf32>
    %129 = vector.extract_strided_slice %5 {offsets = [4, 0], sizes = [1, 32], strides = [1, 1]} : vector<9x32xf32> to vector<1x32xf32>
    %130 = vector.extract_strided_slice %5 {offsets = [5, 0], sizes = [1, 32], strides = [1, 1]} : vector<9x32xf32> to vector<1x32xf32>
    %cst_43 = arith.constant dense<0.000000e+00> : vector<16xf32>
    %131 = vector.multi_reduction <add>, %128, %cst_43 [1] : vector<16x32xf32> to vector<16xf32>
    %132 = vector.shape_cast %131 : vector<16xf32> to vector<16x1xf32>
    %cst_44 = arith.constant 3.200000e+01 : f32
    %133 = vector.broadcast %cst_44 : f32 to vector<16x1xf32>
    %134 = arith.divf %132, %133 : vector<16x1xf32>
    %135 = vector.broadcast %134 : vector<16x1xf32> to vector<16x32xf32>
    %136 = arith.subf %128, %135 : vector<16x32xf32>
    %137 = arith.mulf %136, %136 : vector<16x32xf32>
    %cst_45 = arith.constant dense<0.000000e+00> : vector<16xf32>
    %138 = vector.multi_reduction <add>, %137, %cst_45 [1] : vector<16x32xf32> to vector<16xf32>
    %139 = vector.shape_cast %138 : vector<16xf32> to vector<16x1xf32>
    %cst_46 = arith.constant 3.200000e+01 : f32
    %140 = vector.broadcast %cst_46 : f32 to vector<16x1xf32>
    %141 = arith.divf %139, %140 : vector<16x1xf32>
    %142 = vector.broadcast %134 : vector<16x1xf32> to vector<16x32xf32>
    %143 = arith.subf %128, %142 : vector<16x32xf32>
    %cst_47 = arith.constant 9.99999974E-6 : f32
    %144 = vector.broadcast %cst_47 : f32 to vector<16x1xf32>
    %145 = arith.addf %141, %144 : vector<16x1xf32>
    %146 = math.rsqrt %145 : vector<16x1xf32>
    %147 = vector.broadcast %146 : vector<16x1xf32> to vector<16x32xf32>
    %148 = arith.mulf %143, %147 : vector<16x32xf32>
    %149 = vector.broadcast %129 : vector<1x32xf32> to vector<16x32xf32>
    %150 = arith.mulf %148, %149 : vector<16x32xf32>
    %151 = vector.broadcast %130 : vector<1x32xf32> to vector<16x32xf32>
    %152 = arith.addf %150, %151 : vector<16x32xf32>
    %153 = arith.truncf %152 : vector<16x32xf32> to vector<16x32xbf16>
    %c0_48 = arith.constant 0 : index
    %c0_49 = arith.constant 0 : index
    %c0_50 = arith.constant 0 : index
    %154 = vector.load %arg6[%c0_48, %c0_49, %c0_50] : memref<1x32x2048xbf16, #tpu.memory_space<vmem>>, vector<1x32x2048xbf16>
    %155 = vector.shape_cast %154 : vector<1x32x2048xbf16> to vector<32x2048xbf16>
    %cst_51 = arith.constant dense<0.000000e+00> : vector<16x2048xf32>
    %156 = tpu.matmul %153, %155, %cst_51 {dimension_numbers = #tpu.dot_dimension_numbers<[1], [0], [0], [1], [0, 0, 1, 1], [], []>} : vector<16x32xbf16>, vector<32x2048xbf16>, vector<16x2048xf32> -> vector<16x2048xf32>
    %c0_52 = arith.constant 0 : index
    %c0_53 = arith.constant 0 : index
    %c0_54 = arith.constant 0 : index
    %157 = vector.load %arg7[%c0_52, %c0_53, %c0_54] : memref<1x1x2048xf32, #tpu.memory_space<vmem>>, vector<1x1x2048xf32>
    %158 = vector.shape_cast %157 : vector<1x1x2048xf32> to vector<1x2048xf32>
    %159 = vector.broadcast %158 : vector<1x2048xf32> to vector<16x2048xf32>
    %160 = arith.addf %156, %159 : vector<16x2048xf32>
    %cst_55 = arith.constant 0.000000e+00 : f32
    %161 = vector.broadcast %cst_55 : f32 to vector<16x2048xf32>
    %162 = arith.maximumf %160, %161 : vector<16x2048xf32>
    %163 = arith.truncf %162 : vector<16x2048xf32> to vector<16x2048xbf16>
    %c0_56 = arith.constant 0 : index
    %c0_57 = arith.constant 0 : index
    %c0_58 = arith.constant 0 : index
    %164 = vector.load %arg8[%c0_56, %c0_57, %c0_58] : memref<1x2048x32xbf16, #tpu.memory_space<vmem>>, vector<1x2048x32xbf16>
    %165 = vector.shape_cast %164 : vector<1x2048x32xbf16> to vector<2048x32xbf16>
    %cst_59 = arith.constant dense<0.000000e+00> : vector<16x32xf32>
    %166 = tpu.matmul %163, %165, %cst_59 {dimension_numbers = #tpu.dot_dimension_numbers<[1], [0], [0], [1], [0, 0, 1, 1], [], []>} : vector<16x2048xbf16>, vector<2048x32xbf16>, vector<16x32xf32> -> vector<16x32xf32>
    %167 = vector.extract_strided_slice %5 {offsets = [6, 0], sizes = [1, 32], strides = [1, 1]} : vector<9x32xf32> to vector<1x32xf32>
    %168 = vector.broadcast %167 : vector<1x32xf32> to vector<16x32xf32>
    %169 = arith.addf %166, %168 : vector<16x32xf32>
    %170 = arith.addf %152, %169 : vector<16x32xf32>
    %171 = vector.extract_strided_slice %5 {offsets = [7, 0], sizes = [1, 32], strides = [1, 1]} : vector<9x32xf32> to vector<1x32xf32>
    %172 = vector.extract_strided_slice %5 {offsets = [8, 0], sizes = [1, 32], strides = [1, 1]} : vector<9x32xf32> to vector<1x32xf32>
    %cst_60 = arith.constant dense<0.000000e+00> : vector<16xf32>
    %173 = vector.multi_reduction <add>, %170, %cst_60 [1] : vector<16x32xf32> to vector<16xf32>
    %174 = vector.shape_cast %173 : vector<16xf32> to vector<16x1xf32>
    %cst_61 = arith.constant 3.200000e+01 : f32
    %175 = vector.broadcast %cst_61 : f32 to vector<16x1xf32>
    %176 = arith.divf %174, %175 : vector<16x1xf32>
    %177 = vector.broadcast %176 : vector<16x1xf32> to vector<16x32xf32>
    %178 = arith.subf %170, %177 : vector<16x32xf32>
    %179 = arith.mulf %178, %178 : vector<16x32xf32>
    %cst_62 = arith.constant dense<0.000000e+00> : vector<16xf32>
    %180 = vector.multi_reduction <add>, %179, %cst_62 [1] : vector<16x32xf32> to vector<16xf32>
    %181 = vector.shape_cast %180 : vector<16xf32> to vector<16x1xf32>
    %cst_63 = arith.constant 3.200000e+01 : f32
    %182 = vector.broadcast %cst_63 : f32 to vector<16x1xf32>
    %183 = arith.divf %181, %182 : vector<16x1xf32>
    %184 = vector.broadcast %176 : vector<16x1xf32> to vector<16x32xf32>
    %185 = arith.subf %170, %184 : vector<16x32xf32>
    %cst_64 = arith.constant 9.99999974E-6 : f32
    %186 = vector.broadcast %cst_64 : f32 to vector<16x1xf32>
    %187 = arith.addf %183, %186 : vector<16x1xf32>
    %188 = math.rsqrt %187 : vector<16x1xf32>
    %189 = vector.broadcast %188 : vector<16x1xf32> to vector<16x32xf32>
    %190 = arith.mulf %185, %189 : vector<16x32xf32>
    %191 = vector.broadcast %171 : vector<1x32xf32> to vector<16x32xf32>
    %192 = arith.mulf %190, %191 : vector<16x32xf32>
    %193 = vector.broadcast %172 : vector<1x32xf32> to vector<16x32xf32>
    %194 = arith.addf %192, %193 : vector<16x32xf32>
    %c0_65 = arith.constant 0 : index
    %c0_66 = arith.constant 0 : index
    %195 = vector.load %arg13[%c0_65, %c0_66] : memref<16x32xf32, #tpu.memory_space<vmem>>, vector<16x32xf32>
    tpu.vector_store %arg13[%c0_65, %c0_66], %194 {strides = array<i32>} : memref<16x32xf32, #tpu.memory_space<vmem>>, vector<16x32xf32>,
    %c5_i32 = arith.constant 5 : i32
    %196 = arith.cmpi eq, %arg0, %c5_i32 : i32
    %197 = arith.extui %196 : i1 to i32
    %c0_i32_67 = arith.constant 0 : i32
    %198 = arith.cmpi ne, %197, %c0_i32_67 : i32
    scf.if %198 {
      %c0_68 = arith.constant 0 : index
      %c0_69 = arith.constant 0 : index
      %199 = vector.load %arg9[%c0_68, %c0_69] : memref<32x1xf32, #tpu.memory_space<vmem>>, vector<32x1xf32>
      %cst_70 = arith.constant dense<0.000000e+00> : vector<16x1xf32>
      %200 = tpu.matmul %194, %199, %cst_70 {dimension_numbers = #tpu.dot_dimension_numbers<[1], [0], [0], [1], [0, 0, 1, 1], [], []>} : vector<16x32xf32>, vector<32x1xf32>, vector<16x1xf32> -> vector<16x1xf32>
      %c0_71 = arith.constant 0 : index
      %c0_72 = arith.constant 0 : index
      %201 = vector.load %arg10[%c0_71, %c0_72] : memref<2x16xf32, #tpu.memory_space<vmem>>, vector<2x16xf32>
      %cst_73 = arith.constant dense<0.000000e+00> : vector<2x1xf32>
      %202 = tpu.matmul %201, %200, %cst_73 {dimension_numbers = #tpu.dot_dimension_numbers<[1], [0], [0], [1], [0, 0, 1, 1], [], []>} : vector<2x16xf32>, vector<16x1xf32>, vector<2x1xf32> -> vector<2x1xf32>
      %c0_74 = arith.constant 0 : index
      %c0_75 = arith.constant 0 : index
      %203 = vector.load %arg11[%c0_74, %c0_75] : memref<1x1xf32, #tpu.memory_space<vmem>>, vector<1x1xf32>
      %204 = vector.broadcast %203 : vector<1x1xf32> to vector<2x1xf32>
      %205 = arith.addf %202, %204 : vector<2x1xf32>
      %206 = arith.negf %205 : vector<2x1xf32>
      %207 = math.exp %206 : vector<2x1xf32>
      %cst_76 = arith.constant 1.000000e+00 : f32
      %208 = vector.broadcast %cst_76 : f32 to vector<2x1xf32>
      %209 = arith.addf %208, %207 : vector<2x1xf32>
      %210 = arith.divf %208, %209 : vector<2x1xf32>
      %cst_77 = arith.constant 2.300000e+01 : f32
      %211 = vector.broadcast %cst_77 : f32 to vector<2x1xf32>
      %212 = arith.mulf %210, %211 : vector<2x1xf32>
      %c0_78 = arith.constant 0 : index
      %c0_79 = arith.constant 0 : index
      %213 = vector.load %arg12[%c0_78, %c0_79] : memref<2x1xf32, #tpu.memory_space<vmem>>, vector<2x1xf32>
      tpu.vector_store %arg12[%c0_78, %c0_79], %212 {strides = array<i32>} : memref<2x1xf32, #tpu.memory_space<vmem>>, vector<2x1xf32>,
    } else {
    }
    return
  }
  func.func @transform_0(%arg0: i32) -> (i32, i32) {
    %c0_i32 = arith.constant 0 : i32
    %c0_i32_0 = arith.constant 0 : i32
    %c0_i32_1 = arith.constant 0 : i32
    return %c0_i32, %c0_i32_0 : i32, i32
  }
  func.func @transform_1(%arg0: i32) -> (i32, i32) {
    %c0_i32 = arith.constant 0 : i32
    %c0_i32_0 = arith.constant 0 : i32
    %c0_i32_1 = arith.constant 0 : i32
    return %c0_i32, %c0_i32_0 : i32, i32
  }
  func.func @transform_2(%arg0: i32) -> (i32, i32, i32) {
    %c0_i32 = arith.constant 0 : i32
    %c0_i32_0 = arith.constant 0 : i32
    %c0_i32_1 = arith.constant 0 : i32
    return %arg0, %c0_i32, %c0_i32_0 : i32, i32, i32
  }
  func.func @transform_3(%arg0: i32) -> (i32, i32, i32) {
    %c0_i32 = arith.constant 0 : i32
    %c0_i32_0 = arith.constant 0 : i32
    %c0_i32_1 = arith.constant 0 : i32
    return %arg0, %c0_i32, %c0_i32_0 : i32, i32, i32
  }
  func.func @transform_4(%arg0: i32) -> (i32, i32, i32) {
    %c0_i32 = arith.constant 0 : i32
    %c0_i32_0 = arith.constant 0 : i32
    %c0_i32_1 = arith.constant 0 : i32
    return %arg0, %c0_i32, %c0_i32_0 : i32, i32, i32
  }
  func.func @transform_5(%arg0: i32) -> (i32, i32, i32) {
    %c0_i32 = arith.constant 0 : i32
    %c0_i32_0 = arith.constant 0 : i32
    %c0_i32_1 = arith.constant 0 : i32
    return %arg0, %c0_i32, %c0_i32_0 : i32, i32, i32
  }
  func.func @transform_6(%arg0: i32) -> (i32, i32, i32) {
    %c0_i32 = arith.constant 0 : i32
    %c0_i32_0 = arith.constant 0 : i32
    %c0_i32_1 = arith.constant 0 : i32
    return %arg0, %c0_i32, %c0_i32_0 : i32, i32, i32
  }
  func.func @transform_7(%arg0: i32) -> (i32, i32, i32) {
    %c0_i32 = arith.constant 0 : i32
    %c0_i32_0 = arith.constant 0 : i32
    %c0_i32_1 = arith.constant 0 : i32
    return %arg0, %c0_i32, %c0_i32_0 : i32, i32, i32
  }
  func.func @transform_8(%arg0: i32) -> (i32, i32) {
    %c0_i32 = arith.constant 0 : i32
    %c0_i32_0 = arith.constant 0 : i32
    %c0_i32_1 = arith.constant 0 : i32
    return %c0_i32, %c0_i32_0 : i32, i32
  }
  func.func @transform_9(%arg0: i32) -> (i32, i32) {
    %c0_i32 = arith.constant 0 : i32
    %c0_i32_0 = arith.constant 0 : i32
    %c0_i32_1 = arith.constant 0 : i32
    return %c0_i32, %c0_i32_0 : i32, i32
  }
  func.func @transform_10(%arg0: i32) -> (i32, i32) {
    %c0_i32 = arith.constant 0 : i32
    %c0_i32_0 = arith.constant 0 : i32
    %c0_i32_1 = arith.constant 0 : i32
    return %c0_i32, %c0_i32_0 : i32, i32
  }
  func.func @transform_11(%arg0: i32) -> (i32, i32) {
    %c0_i32 = arith.constant 0 : i32
    %c0_i32_0 = arith.constant 0 : i32
    %c0_i32_1 = arith.constant 0 : i32
    return %c0_i32, %c0_i32_0 : i32, i32
  }
}

</mosaic_0001>

<bundles_post_ra>
// kernel: multimodal_transformer_forward.1
= control target key start
LH: loop header
LB: loop body
LE: loop exit
PB: predicated region body
PF: predicated region fallthrough
CT: control target
= control target key end

     0   :  { %s4631_s19 = smov 0   ;;  %s5193_s0 = inlined_call_operand.vmem [shape: f32[16,32], index: 0, kind: input, shape index: {}]   ;;  %s5194_s1 = inlined_call_operand.vmem [shape: f32[16,16], index: 1, kind: input, shape index: {}]   ;;  %s5195_s2 = inlined_call_operand.vmem [shape: bf16[6,32,96], index: 2, kind: input, shape index: {}]   ;;  %s5196_s3 = inlined_call_operand.vmem [shape: f32[6,9,32], index: 3, kind: input, shape index: {}]   ;;  %s5197_s4 = inlined_call_operand.vmem [shape: bf16[6,32,32], index: 4, kind: input, shape index: {}]   ;;  %s5198_s5 = inlined_call_operand.vmem [shape: bf16[6,32,2048], index: 5, kind: input, shape index: {}]   ;;  %s5199_s6 = inlined_call_operand.vmem [shape: f32[6,1,2048], index: 6, kind: input, shape index: {}]   ;;  %s5200_s7 = inlined_call_operand.vmem [shape: bf16[6,2048,32], index: 7, kind: input, shape index: {}]   ;;  %s5201_s8 = inlined_call_operand.vmem [shape: f32[32,1], index: 8, kind: input, shape index: {}]   ;;  %s5202_s9 = inlined_call_operand.vmem [shape: f32[2,16], index: 9, kind: input, shape index: {}]   ;;  %s5203_s10 = inlined_call_operand.<no memory space> [shape: f32[1,1], index: 10, kind: input, shape index: {}]   ;;  %s5204_s11 = inlined_call_operand.vmem [shape: f32[2,1], index: 11, kind: output, shape index: {}]  }
   0x1   :  { %v16_v0 = vstv %s5203_s10 }
   0x2   :  { %17 = vst [vmem:[#allocation3] sm:$0x1] %v16_v0 }
   0x3 LB: > { %s4637_s20 = sadd.s32 4294967295, %s4558_s19   ;;  %p3818_p0 = scmp.ge.s32.totalorder %s4558_s19, 1  ;;  %s4558_s19 = sphi %s4631_s19, %s23_s19  }
   0x4   : > { %p383_p1 = scmp.lt.s32.totalorder %s4558_s19, 7 }
   0x6   : > { %p384_p2 = pnand %p3818_p0, %p383_p1 }
   0x7   : > { %p442_p3 = scmp.lt.s32.totalorder (!%p384_p2), %s4637_s20, 5  ;;  %p3830_p4 = scmp.ne.s32.totalorder (!%p384_p2), %s4637_s20, 0 }
   0x8   : > { %387 = sbr.rel (%p384_p2) target bundleno = 3373 (0xd2d), region = 64 }
   0xd   : > { %s443_s10 = scalar_select %p442_p3, %s4637_s20, 5 }
   0xf   : > { %s4038_s21 = sshll.u32 %s443_s10, 4  ;;  %s4041_s22 = sshll.u32 %s443_s10, 8 }
  0x10   : > { %s446_s25 = scalar_lea.vmem %s5195_s2, %s4038_s21  ;;  %s4649_s28 = scalar_lea.vmem %s5196_s3, %s4038_s21 }
  0x11   : > { %s4654_s12 = scalar_lea.vmem %s5197_s4, %s4038_s21  ;;  %s4659_s15 = scalar_lea.vmem %s5198_s5, %s4041_s22 }
  0x12   : > { %s4664_s18 = scalar_lea.vmem %s5199_s6, %s4038_s21  ;;  %s4042_s23 = sshll.u32 %s443_s10, 10 }
  0x13   : > { %s4669_s27 = scalar_lea.vmem %s5200_s7, %s4042_s23  ;;  %475 = sbr.rel (%p3830_p4) target bundleno = 26 (0x1a), region = 68 }
  0x18   : > { %v476_v1 = vld [vmem:[%s5193_s0] sm:$0xff]  ;;  %vm478_vm0 = vcmask 261120   ;;  %v477_v2 = vld [vmem:[%s5193_s0 + $0x8] sm:$0xff] }
  0x19   : > { %479 = vst.msk [vmem:[#allocation2] sm:$0xff] %vm478_vm0, %v476_v1  ;;  %480 = vst.msk [vmem:[#allocation2 + $0x8] sm:$0xff] %vm478_vm0, %v477_v2 }
  0x1a PF: > { %v4372_v3 = vld [vmem:[%s446_s25 + $0x8] sm:$0xff]   ;;  %v549_v4 = vlaneseq  ;;  %v4560_v5 = vmov 0.0   ;;  %v4373_v6 = vld [vmem:[%s446_s25] sm:$0xff]   ;;  %vm4561_vm1 = vmmov 0   ;;  %vm504_vm2 = vcmask 261120   ;;  %s4562_s10 = smov 32  }
  0x1b   : > { %4266 = vmatprep.subr.bf16.mxu0 %v4560_v5  ;;  %4270 = vmatprep.mubr.msk.bf16.mxu0 %vm4561_vm1, %v4560_v5  ;;  %v4682_v9 = vld [vmem:[%s4649_s28] sm:$0xff]  ;;  %s4563_s21 = smov 96   ;;  %v4778_v37 = vld [vmem:[%s5194_s1 + $0x8] sm:$0xff]  ;;  %vm674_vm10 = vcmask 130048   ;;  %s4564_s23 = smov 64  }
  0x1c   : > { %4267 = vmatpush3.bf16.msra.mxu0 %v4372_v3  ;;  %v4684_v10 = vshrl.u32 %v549_v4, 7  ;;  %v4693_v14 = vand.u32 127, %v549_v4  ;;  %v4783_v40 = vld [vmem:[%s5194_s1] sm:$0xff]  ;;  %p4030_p5 = scmp.ne.s32.totalorder %s4637_s20, 5 }
  0x1d   : > { %4268 = vmatprep.subr.bf16.mxu0 %v4560_v5 }
  0x1e   : > { %v4688_v11 = vsub.s32 1, %v4684_v10  ;;  %v4696_v15 = vsub.s32 0, %v4684_v10  ;;  %vm790_vm3 = vcmp.ge.s32.totalorder %v4693_v14, 8  ;;  %vm791_vm4 = vcmp.lt.s32.totalorder %v4693_v14, 16 }
  0x1f   : > { %vm792_vm5 = vmand %vm790_vm3, %vm791_vm4  ;;  %vm578_vm6 = vcmp.lt.s32.totalorder %v4693_v14, 8  ;;  %vm984_vm7 = vcmp.ge.s32.totalorder %v4693_v14, 16  ;;  %vm985_vm8 = vcmp.lt.s32.totalorder %v4693_v14, 24  ;;  %v4798_v57 = vsub.s32 2, %v4684_v10 }
  0x20   : > { %v481_v7 = vld [vmem:[#allocation2] sm:$0xff]  ;;  %v482_v8 = vld [vmem:[#allocation2 + $0x8] sm:$0xff]  ;;  %4269 = vmatpush3.bf16.msra.mxu0 %v4373_v6  ;;  %v558_v13 = vrot.slane %v4682_v9, %v4688_v11  ;;  %v552_v16 = vrot.slane %v4682_v9, %v4696_v15  ;;  %v4706_v19 = vsel %vm792_vm5, 1.0, %v4560_v5  ;;  %v4709_v20 = vsel %vm578_vm6, 1.0, %v4560_v5  ;;  %vm986_vm9 = vmand %vm984_vm7, %vm985_vm8 }
  0x21   : > { %v487_v12 = vpack.c.bf16 %v482_v8, %v481_v7  ;;  %v4746_v32 = vsel %vm986_vm9, 1.0, %v4560_v5  ;;  %v568_v58 = vrot.slane %v4682_v9, %v4798_v57  ;;  %vm1178_vm11 = vcmp.ge.s32.totalorder %v4693_v14, 24 }
  0x22   : > { %560 = vrot.lane.b32.xlu0 %v558_v13, %s4562_s10  ;;  %vm1179_vm12 = vcmp.lt.s32.totalorder %v4693_v14, 32 }
  0x23   : > { %4271 = vmatmul.mubr.msk.bf16.vlgmr.msra.gmra.mxu0 %vm504_vm2, %v487_v12  ;;  %vm1180_vm13 = vmand %vm1178_vm11, %vm1179_vm12 }
  0x94   : > { %v561_v17 = vpop.permute.xlu0 %560 }
  0xe3   : > { %v4703_v18 = vpop.f32.mrf.mxu0 }
  0xe4   : > { %v4712_v21 = vadd.f32 %v552_v16, %v4703_v18  ;;  %v563_v22 = vadd.f32 %v561_v17, %v4703_v18 }
  0xe5   : > { %v4272_v23 = vpop.f32.mrf.mxu0 }
  0xe6   : > { %585 = vrot.lane.b32.xlu1 %v563_v22, %s4563_s21  ;;  %v581_v24 = vmul.f32 %v4709_v20, %v4712_v21  ;;  %v794_v25 = vmul.f32 %v4706_v19, %v4712_v21  ;;  %v988_v35 = vmul.f32 %v4746_v32, %v4712_v21 }
  0xe7   : > { %v4719_v26 = vpop.f32.mrf.mxu0 }
  0xe8   : > { %v564_v27 = vadd.f32 %v561_v17, %v4719_v26  ;;  %4278 = vmatprep.mubr.msk.f32.mxu1 %vm504_vm2, %v581_v24  ;;  %4292 = vmatprep.mubr.msk.f32.mxu0 %vm504_vm2, %v794_v25  ;;  %v4739_v31 = vadd.f32 %v552_v16, %v4719_v26 }
  0xe9   : > { %v4273_v28 = vpop.f32.mrf.mxu0 }
  0xea   : > { %587 = vrot.lane.b32.xlu0 %v564_v27, %s4563_s21  ;;  %v795_v33 = vmul.f32 %v4706_v19, %v4739_v31  ;;  %v582_v34 = vmul.f32 %v4709_v20, %v4739_v31  ;;  %v989_v36 = vmul.f32 %v4746_v32, %v4739_v31 }
 0x158   : > { %v4732_v30 = vpop.permute.xlu1 %585 }
 0x15c   : > { %v4726_v29 = vpop.permute.xlu0 %587 }
 0x15d   : > { %4274 = vmatprep.subr.msk.mxu1 %vm504_vm2, %v4726_v29  ;;  %4288 = vmatprep.subr.msk.mxu0 %vm504_vm2, %v4726_v29 }
 0x15e   : > { %4275 = vmatpush3.xpose.msk.msra.mxu1 %vm504_vm2, %v4726_v29  ;;  %4289 = vmatpush3.xpose.msk.msra.mxu0 %vm504_vm2, %v4726_v29 }
 0x15f   : > { %4276 = vmatprep.subr.msk.mxu1 %vm504_vm2, %v4732_v30  ;;  %4290 = vmatprep.subr.msk.mxu0 %vm504_vm2, %v4732_v30 }
 0x162   : > { %4277 = vmatpush3.xpose.msk.msra.mxu1 %vm504_vm2, %v4732_v30  ;;  %4291 = vmatpush3.xpose.msk.msra.mxu0 %vm504_vm2, %v4732_v30 }
 0x163   : > { %4302 = vmatprep.subr.msk.mxu0 %vm504_vm2, %v4726_v29 }
 0x165   : > { %4279 = vmatmul.mubr.msk.f32.vlgmr.msra.gmra.mxu1 %vm504_vm2, %v582_v34  ;;  %4293 = vmatmul.mubr.msk.f32.vlgmr.msra.gmra.mxu0 %vm504_vm2, %v795_v33 }
 0x166   : > { %4303 = vmatpush3.xpose.msk.msra.mxu0 %vm504_vm2, %v4726_v29  ;;  %4306 = vmatprep.mubr.msk.f32.mxu0 %vm504_vm2, %v988_v35 }
 0x167   : > { %4304 = vmatprep.subr.msk.mxu0 %vm504_vm2, %v4732_v30 }
 0x16a   : > { %4305 = vmatpush3.xpose.msk.msra.mxu0 %vm504_vm2, %v4732_v30 }
 0x16b   : > { %4330 = vmatprep.subr.bf16.mxu0 %v4560_v5 }
 0x16d   : > { %4307 = vmatmul.mubr.msk.f32.vlgmr.msra.gmra.mxu0 %vm504_vm2, %v989_v36 }
 0x16e   : > { %4334 = vmatprep.mubr.msk.bf16.mxu0 %vm4561_vm1, %v4560_v5 }
 0x225   : > { %v4280_v38 = vpop.f32.mrf.mxu1  ;;  %v4294_v39 = vpop.f32.mrf.mxu0 }
 0x226   : > { %v671_v41 = vadd.f32 %v4280_v38, %v4778_v37  ;;  %v874_v47 = vadd.f32 %v4294_v39, %v4778_v37 }
 0x227   : > { %v665_v42 = vpop.f32.mrf.mxu1  ;;  %v868_v43 = vpop.f32.mrf.mxu0 }
 0x228   : > { %v666_v44 = vadd.f32 %v665_v42, %v4783_v40  ;;  %v869_v45 = vadd.f32 %v868_v43, %v4783_v40  ;;  %v678_v46 = vsel %vm674_vm10, %v671_v41, -inf  ;;  %v880_v52 = vsel %vm674_vm10, %v874_v47, -inf }
 0x229   : > { %679 = vmax.xlane.f32.xlu0 %v678_v46 }
 0x22a   : > { %v675_v48 = vsel %vm674_vm10, %v666_v44, -inf  ;;  %v877_v49 = vsel %vm674_vm10, %v869_v45, -inf }
 0x22b   : > { %676 = vmax.xlane.f32.xlu1 %v675_v48 }
 0x22d   : > { %v4308_v50 = vpop.f32.mrf.mxu0  ;;  %878 = vmax.xlane.f32.xlu0 %v877_v49 }
 0x22e   : > { %v1068_v51 = vadd.f32 %v4308_v50, %v4778_v37 }
 0x22f   : > { %881 = vmax.xlane.f32.xlu1 %v880_v52  ;;  %v1062_v53 = vpop.f32.mrf.mxu0 }
 0x230   : > { %v1063_v54 = vadd.f32 %v1062_v53, %v4783_v40  ;;  %v1074_v55 = vsel %vm674_vm10, %v1068_v51, -inf }
 0x232   : > { %v1071_v56 = vsel %vm674_vm10, %v1063_v54, -inf }
 0x233   : > { %1075 = vmax.xlane.f32.xlu1 %v1074_v55  ;;  %1072 = vmax.xlane.f32.xlu0 %v1071_v56 }
 0x249   : > { %570 = vrot.lane.b32.xlu0 %v568_v58, %s4564_s23 }
 0x2b2   : > { %v680_v59 = vpop.xlane.xlu0 %679 }
 0x2b3   : > { %v682_v60 = vsub.f32 %v671_v41, %v680_v59 }
 0x2b4   : > { %v677_v61 = vpop.xlane.xlu1 %676 }
 0x2b5   : > { %v685_v62 = vmul.f32 1.442695, %v682_v60  ;;  %v681_v63 = vsub.f32 %v666_v44, %v677_v61  ;;  %v4820_v61 = vsel %vm1180_vm13, 1.0, %v4560_v5 }
 0x2b6   : > { %v879_v0 = vpop.xlane.xlu0 %878 }
 0x2b7   : > { %4504 = vpow2.f32 %v685_v62  ;;  %v683_v3 = vmul.f32 1.442695, %v681_v63  ;;  %v883_v4 = vsub.f32 %v869_v45, %v879_v0  ;;  %v1182_v63 = vmul.f32 %v4820_v61, %v4712_v21 }
 0x2b8   : > { %v882_v1 = vpop.xlane.xlu1 %881  ;;  %v1183_v0 = vmul.f32 %v4820_v61, %v4739_v31 }
 0x2b9   : > { %v884_v2 = vsub.f32 %v874_v47, %v882_v1  ;;  %v885_v9 = vmul.f32 1.442695, %v883_v4 }
 0x2bb   : > { %v887_v6 = vmul.f32 1.442695, %v884_v2 }
 0x2bc   : > { %v1076_v7 = vpop.xlane.xlu1 %1075  ;;  %v1073_v8 = vpop.xlane.xlu0 %1072 }
 0x2bd   : > { %4506 = vpow2.f32 %v887_v6  ;;  %v1078_v12 = vsub.f32 %v1068_v51, %v1076_v7  ;;  %v1077_v22 = vsub.f32 %v1063_v54, %v1073_v8 }
 0x2be   : > { %4508 = vpow2.f32 %v683_v3 }
 0x2bf   : > { %4510 = vpow2.f32 %v885_v9  ;;  %v1081_v17 = vmul.f32 1.442695, %v1078_v12  ;;  %v1079_v25 = vmul.f32 1.442695, %v1077_v22 }
 0x2c0   : > { %v571_v13 = vpop.permute.xlu0 %570 }
 0x2c1   : > { %v574_v16 = vadd.f32 %v571_v13, %v4719_v26  ;;  %4512 = vpow2.f32 %v1081_v17  ;;  %v573_v42 = vadd.f32 %v571_v13, %v4703_v18 }
 0x2c2   : > { %4514 = vpow2.f32 %v1079_v25 }
 0x2c3   : > { %701 = vrot.lane.b32.xlu0 %v574_v16, %s4564_s23 }
 0x2c4   : > { %v4505_v23 = vpop.eup %4504 }
 0x2c5   : > { %v690_v24 = vsel %vm674_vm10, %v4505_v23, 0.0 }
 0x2c6   : > { %691 = vadd.xlane.f32.xlu1 %v690_v24 }
 0x2ca   : > { %v4507_v27 = vpop.eup %4506 }
 0x2cb   : > { %v892_v28 = vsel %vm674_vm10, %v4507_v27, 0.0  ;;  %v4509_v33 = vpop.eup %4508 }
 0x2cc   : > { %893 = vadd.xlane.f32.xlu1 %v892_v28  ;;  %v687_v34 = vsel %vm674_vm10, %v4509_v33, 0.0  ;;  %v4511_v26 = vpop.eup %4510 }
 0x2cd   : > { %v889_v35 = vsel %vm674_vm10, %v4511_v26, 0.0 }
 0x2ce   : > { %v4513_v36 = vpop.eup %4512 }
 0x2cf   : > { %v1086_v38 = vsel %vm674_vm10, %v4513_v36, 0.0  ;;  %v4515_v39 = vpop.eup %4514 }
 0x2d0   : > { %688 = vadd.xlane.f32.xlu1 %v687_v34  ;;  %v1083_v41 = vsel %vm674_vm10, %v4515_v39, 0.0 }
 0x2d4   : > { %890 = vadd.xlane.f32.xlu1 %v889_v35 }
 0x2d8   : > { %1087 = vadd.xlane.f32.xlu1 %v1086_v38 }
 0x2dc   : > { %1084 = vadd.xlane.f32.xlu1 %v1083_v41 }
 0x2ed   : > { %699 = vrot.lane.b32.xlu1 %v573_v42, %s4564_s23 }
 0x335   : > { %v702_v43 = vpop.permute.xlu0 %701 }
 0x336   : > { %4281 = vmatprep.subr.mxu1 %v702_v43 }
 0x337   : > { %4282 = vmatpush3.msra.mxu1 %v702_v43 }
 0x34f   : > { %v692_v44 = vpop.xlane.xlu1 %691 }
 0x350   : > { %4516 = vrcp.f32 %v692_v44 }
 0x355   : > { %v894_v45 = vpop.xlane.xlu1 %893 }
 0x359   : > { %v689_v46 = vpop.xlane.xlu1 %688 }
 0x35a   : > { %4518 = vrcp.f32 %v689_v46  ;;  %v4375_v46 = vld [vmem:[%s4654_s12] sm:$0xff]  }
 0x35b   : > { %4520 = vrcp.f32 %v894_v45  ;;  %v4374_v45 = vld [vmem:[%s4654_s12 + $0x8] sm:$0xff]  }
 0x35c   : > { %4331 = vmatpush3.bf16.msra.mxu0 %v4374_v45 }
 0x35d   : > { %v891_v47 = vpop.xlane.xlu1 %890  ;;  %v4517_v50 = vpop.eup %4516  ;;  %4332 = vmatprep.subr.bf16.mxu0 %v4560_v5 }
 0x35e   : > { %4522 = vrcp.f32 %v891_v47  ;;  %v696_v54 = vmul.f32 %v4517_v50, %v4505_v23 }
 0x360   : > { %4333 = vmatpush3.bf16.msra.mxu0 %v4375_v46 }
 0x361   : > { %v1088_v48 = vpop.xlane.xlu1 %1087 }
 0x362   : > { %4524 = vrcp.f32 %v1088_v48 }
 0x365   : > { %v1085_v49 = vpop.xlane.xlu1 %1084 }
 0x366   : > { %4526 = vrcp.f32 %v1085_v49 }
 0x367   : > { %v4519_v51 = vpop.eup %4518 }
 0x368   : > { %v695_v18 = vmul.f32 %v4519_v51, %v4509_v33  ;;  %v4521_v53 = vpop.eup %4520 }
 0x369   : > { %v700_v52 = vpop.permute.xlu1 %699  ;;  %v898_v58 = vmul.f32 %v4521_v53, %v4507_v27  ;;  %v4859_v53 = vsub.s32 3, %v4684_v10 }
 0x36a   : > { %4283 = vmatprep.subr.mxu1 %v700_v52  ;;  %4285 = vmatprep.mubr.msk.f32.mxu1 %vm674_vm10, %v695_v18 }
 0x36b   : > { %v4523_v55 = vpop.eup %4522  ;;  %4284 = vmatpush3.msra.mxu1 %v700_v52 }
 0x36c   : > { %4286 = vmatmul.mubr.msk.f32.vlgmr.msra.gmra.mxu1 %vm674_vm10, %v696_v54  ;;  %4295 = vmatprep.subr.mxu1 %v702_v43  ;;  %v897_v56 = vmul.f32 %v4523_v55, %v4511_v26  ;;  %v4862_v54 = vld [vmem:[%s4649_s28] sm:$0xff] }
 0x36d   : > { %4296 = vmatpush3.msra.mxu1 %v702_v43  ;;  %v1380_v5 = vrot.slane %v4862_v54, %v4859_v53 }
 0x36e   : > { %4297 = vmatprep.subr.mxu1 %v700_v52  ;;  %4299 = vmatprep.mubr.msk.f32.mxu1 %vm674_vm10, %v897_v56 }
 0x36f   : > { %4298 = vmatpush3.msra.mxu1 %v700_v52  ;;  %v4525_v59 = vpop.eup %4524 }
 0x370   : > { %4300 = vmatmul.mubr.msk.f32.vlgmr.msra.gmra.mxu1 %vm674_vm10, %v898_v58  ;;  %4309 = vmatprep.subr.mxu1 %v702_v43  ;;  %v1092_v62 = vmul.f32 %v4525_v59, %v4513_v36  ;;  %v4545_v59 = vld [vmem:[#allocation2] sm:$0xff] }
 0x371   : > { %4310 = vmatpush3.msra.mxu1 %v702_v43 }
 0x372   : > { %4311 = vmatprep.subr.mxu1 %v700_v52 }
 0x373   : > { %v4527_v60 = vpop.eup %4526  ;;  %4312 = vmatpush3.msra.mxu1 %v700_v52 }
 0x374   : > { %4316 = vmatprep.subr.msk.mxu1 %vm504_vm2, %v4726_v29  ;;  %v1091_v14 = vmul.f32 %v4527_v60, %v4515_v39 }
 0x376   : > { %4313 = vmatprep.mubr.msk.f32.mxu1 %vm674_vm10, %v1091_v14 }
 0x377   : > { %4314 = vmatmul.mubr.msk.f32.vlgmr.msra.gmra.mxu1 %vm674_vm10, %v1092_v62 }
 0x378   : > { %4317 = vmatpush3.xpose.msk.msra.mxu1 %vm504_vm2, %v4726_v29  ;;  %4320 = vmatprep.mubr.msk.f32.mxu1 %vm504_vm2, %v1182_v63 }
 0x379   : > { %4318 = vmatprep.subr.msk.mxu1 %vm504_vm2, %v4732_v30 }
 0x37c   : > { %4319 = vmatpush3.xpose.msk.msra.mxu1 %vm504_vm2, %v4732_v30 }
 0x37d   : > { %4323 = vmatprep.subr.mxu1 %v702_v43 }
 0x37f   : > { %4321 = vmatmul.mubr.msk.f32.vlgmr.msra.gmra.mxu1 %vm504_vm2, %v1183_v0  ;;  %v4546_v0 = vld [vmem:[#allocation2 + $0x8] sm:$0xff] }
 0x380   : > { %4324 = vmatpush3.msra.mxu1 %v702_v43 }
 0x381   : > { %4325 = vmatprep.subr.mxu1 %v700_v52 }
 0x382   : > { %4326 = vmatpush3.msra.mxu1 %v700_v52 }
 0x42c   : > { %v4287_v21 = vpop.f32.mrf.mxu1 }
 0x42d   : > { %v787_v2 = vmul.f32 %v4287_v21, %v4709_v20 }
 0x42e   : > { %v777_v1 = vpop.f32.mrf.mxu1 }
 0x42f   : > { %v786_v6 = vmul.f32 %v777_v1, %v4709_v20 }
 0x430   : > { %v4301_v29 = vpop.f32.mrf.mxu1 }
 0x431   : > { %v981_v3 = vmul.f32 %v4301_v29, %v4706_v19 }
 0x432   : > { %v971_v4 = vpop.f32.mrf.mxu1 }
 0x433   : > { %v983_v30 = vadd.f32 %v981_v3, %v787_v2  ;;  %v980_v7 = vmul.f32 %v971_v4, %v4706_v19 }
 0x435   : > { %v982_v31 = vadd.f32 %v980_v7, %v786_v6 }
 0x437   : > { %v4315_v8 = vpop.f32.mrf.mxu1 }
 0x438   : > { %v1175_v9 = vmul.f32 %v4315_v8, %v4746_v32 }
 0x439   : > { %v1165_v12 = vpop.f32.mrf.mxu1 }
 0x43a   : > { %v1177_v13 = vadd.f32 %v1175_v9, %v983_v30  ;;  %v1174_v16 = vmul.f32 %v1165_v12, %v4746_v32  ;;  %v1495_v12 = vld [vmem:[%s4659_s15 + $0x80] sm:$0xff] }
 0x43c   : > { %v1176_v17 = vadd.f32 %v1174_v16, %v982_v31  ;;  %v1496_v16 = vld [vmem:[%s4659_s15 + $0x88] sm:$0xff] }
 0x43f   : > { %v4322_v22 = vpop.f32.mrf.mxu1 }
 0x440   : > { %v1262_v23 = vadd.f32 %v4322_v22, %v4778_v37  ;;  %v1504_v22 = vld [vmem:[%s4659_s15 + $0xc8] sm:$0xff] }
 0x441   : > { %v1256_v24 = vpop.f32.mrf.mxu1 }
 0x442   : > { %v1257_v25 = vadd.f32 %v1256_v24, %v4783_v40  ;;  %v1268_v20 = vsel %vm674_vm10, %v1262_v23, -inf  ;;  %v3879_v24 = vcombine.low %v1496_v16, %v1504_v22 }
 0x443   : > { %1269 = vmax.xlane.f32.xlu1 %v1268_v20  ;;  %v1479_v20 = vld [vmem:[%s4659_s15] sm:$0xff] }
 0x444   : > { %v1265_v19 = vsel %vm674_vm10, %v1257_v25, -inf }
 0x445   : > { %1266 = vmax.xlane.f32.xlu0 %v1265_v19  ;;  %v1487_v19 = vld [vmem:[%s4659_s15 + $0x40] sm:$0xff] }
 0x4cc   : > { %v1270_v27 = vpop.xlane.xlu1 %1269 }
 0x4cd   : > { %v1272_v28 = vsub.f32 %v1262_v23, %v1270_v27  ;;  %v1480_v27 = vld [vmem:[%s4659_s15 + $0x8] sm:$0xff] }
 0x4ce   : > { %v1267_v33 = vpop.xlane.xlu0 %1266 }
 0x4cf   : > { %v1271_v34 = vsub.f32 %v1257_v25, %v1267_v33  ;;  %v1275_v26 = vmul.f32 1.442695, %v1272_v28  ;;  %v3880_v25 = vcombine.high %v1496_v16, %v1504_v22  ;;  %v3862_v28 = vcombine.high %v1479_v20, %v1487_v19  ;;  %v1488_v33 = vld [vmem:[%s4659_s15 + $0x48] sm:$0xff] }
 0x4d0   : > { %v1492_v16 = vld [vmem:[%s4659_s15 + $0x68] sm:$0xff] }
 0x4d1   : > { %v1273_v35 = vmul.f32 1.442695, %v1271_v34  ;;  %1813 = vmatprep.subr.bf16.mxu0 %v3880_v25  ;;  %v3861_v34 = vcombine.low %v1479_v20, %v1487_v19  ;;  %v1501_v25 = vld [vmem:[%s4659_s15 + $0xb0] sm:$0xff]  ;;  %v1502_v19 = vld [vmem:[%s4659_s15 + $0xb8] sm:$0xff] }
 0x4d2   : > { %v1509_v20 = vld [vmem:[%s4659_s15 + $0xf0] sm:$0xff] }
 0x4d3   : > { %4528 = vpow2.f32 %v1273_v35  ;;  %v3864_v35 = vcombine.high %v1480_v27, %v1488_v33 }
 0x4d4   : > { %4530 = vpow2.f32 %v1275_v26  ;;  %v3863_v26 = vcombine.low %v1480_v27, %v1488_v33  ;;  %v1510_v27 = vld [vmem:[%s4659_s15 + $0xf8] sm:$0xff] }
 0x4e0   : > { %v4529_v32 = vpop.eup %4528 }
 0x4e1   : > { %v1277_v37 = vsel %vm674_vm10, %v4529_v32, 0.0  ;;  %v4531_v36 = vpop.eup %4530 }
 0x4e2   : > { %1278 = vadd.xlane.f32.xlu0 %v1277_v37  ;;  %v1280_v40 = vsel %vm674_vm10, %v4531_v36, 0.0  ;;  %v1505_v37 = vld [vmem:[%s4659_s15 + $0xd0] sm:$0xff] }
 0x4e6   : > { %1281 = vadd.xlane.f32.xlu0 %v1280_v40 }
 0x56b   : > { %v1279_v38 = vpop.xlane.xlu0 %1278 }
 0x56c   : > { %4532 = vrcp.f32 %v1279_v38  ;;  %v1506_v38 = vld [vmem:[%s4659_s15 + $0xd8] sm:$0xff] }
 0x56f   : > { %v1282_v39 = vpop.xlane.xlu0 %1281 }
 0x570   : > { %4534 = vrcp.f32 %v1282_v39  ;;  %v4565_v39 = vmov 0  }
 0x579   : > { %v4533_v41 = vpop.eup %4532 }
 0x57a   : > { %v1285_v42 = vmul.f32 %v4533_v41, %v4529_v32  ;;  %v1497_v32 = vld [vmem:[%s4659_s15 + $0x90] sm:$0xff] }
 0x57b   : > { %v3882_v40 = vcombine.high %v1497_v32, %v1505_v37  ;;  %v3881_v41 = vcombine.low %v1497_v32, %v1505_v37  ;;  %v1493_v32 = vld [vmem:[%s4659_s15 + $0x70] sm:$0xff]  ;;  %v1486_v37 = vld [vmem:[%s4659_s15 + $0x38] sm:$0xff] }
 0x57c   : > { %4327 = vmatprep.mubr.msk.f32.mxu1 %vm674_vm10, %v1285_v42 }
 0x57d   : > { %v4535_v43 = vpop.eup %4534 }
 0x57e   : > { %v1286_v44 = vmul.f32 %v4535_v43, %v4531_v36  ;;  %v1498_v36 = vld [vmem:[%s4659_s15 + $0x98] sm:$0xff] }
 0x57f   : > { %v3883_v42 = vcombine.low %v1498_v36, %v1506_v38  ;;  %v3884_v43 = vcombine.high %v1498_v36, %v1506_v38  ;;  %v1494_v36 = vld [vmem:[%s4659_s15 + $0x78] sm:$0xff]  ;;  %v3891_v38 = vcombine.low %v1502_v19, %v1510_v27 }
 0x580   : > { %4328 = vmatmul.mubr.msk.f32.vlgmr.msra.gmra.mxu1 %vm674_vm10, %v1286_v44 }
 0x581   : > { %1790 = vmatprep.mubr.bf16.mxu1 %v4565_v39 }
 0x640   : > { %v4329_v47 = vpop.f32.mrf.mxu1 }
 0x641   : > { %v1369_v48 = vmul.f32 %v4329_v47, %v4820_v61 }
 0x642   : > { %v1359_v49 = vpop.f32.mrf.mxu1 }
 0x643   : > { %v1368_v50 = vmul.f32 %v1359_v49, %v4820_v61  ;;  %v1371_v51 = vadd.f32 %v1369_v48, %v1177_v13  ;;  %v1503_v13 = vld [vmem:[%s4659_s15 + $0xc0] sm:$0xff] }
 0x644   : > { %v3877_v23 = vcombine.low %v1495_v12, %v1503_v13 }
 0x645   : > { %v1370_v18 = vadd.f32 %v1368_v50, %v1176_v17  ;;  %v3878_v17 = vcombine.high %v1495_v12, %v1503_v13  ;;  %v4885_v50 = vsub.s32 4, %v4684_v10  ;;  %v1491_v12 = vld [vmem:[%s4659_s15 + $0x60] sm:$0xff]  ;;  %v1484_v13 = vld [vmem:[%s4659_s15 + $0x28] sm:$0xff] }
 0x646   : > { %v3871_v33 = vcombine.low %v1484_v13, %v1492_v16 }
 0x647   : > { %v1372_v52 = vpack.c.bf16 %v1371_v51, %v1370_v18  ;;  %1770 = vmatprep.subr.bf16.mxu1 %v3878_v17  ;;  %v1469_v18 = vrot.slane %v4862_v54, %v4885_v50 }
 0x648   : > { %1771 = vmatpush1.bf16.msra.mxu1 %v3877_v23 }
 0x649   : > { %4335 = vmatmul.mubr.msk.bf16.vlgmr.msra.gmra.mxu0 %vm504_vm2, %v1372_v52  ;;  %1772 = vmatprep.subr.bf16.mxu1 %v3862_v28  ;;  %v4890_v52 = vsub.s32 5, %v4684_v10 }
 0x64a   : > { %1814 = vmatpush1.bf16.msra.mxu0 %v3879_v24  ;;  %1833 = vmatprep.mubr.bf16.mxu0 %v4565_v39  ;;  %v3872_v24 = vcombine.high %v1484_v13, %v1492_v16  ;;  %v4407_v13 = vld [vmem:[%s4669_s27 + $0x80] sm:$0xff]   ;;  %v4408_v16 = vld [vmem:[%s4669_s27 + $0x178] sm:$0xff]  }
 0x64b   : > { %1815 = vmatprep.subr.bf16.mxu0 %v3864_v35  ;;  %v1485_v35 = vld [vmem:[%s4659_s15 + $0x30] sm:$0xff] }
 0x64c   : > { %1773 = vmatpush1.bf16.msra.mxu1 %v3861_v34  ;;  %v3890_v34 = vcombine.high %v1501_v25, %v1509_v20 }
 0x64d   : > { %1856 = vmatprep.subr.bf16.mxu1 %v3882_v40  ;;  %v3889_v40 = vcombine.low %v1501_v25, %v1509_v20 }
 0x64e   : > { %1816 = vmatpush1.bf16.msra.mxu0 %v3863_v26  ;;  %v3892_v26 = vcombine.high %v1502_v19, %v1510_v27 }
 0x64f   : > { %1899 = vmatprep.subr.bf16.mxu0 %v3884_v43  ;;  %v3873_v43 = vcombine.low %v1485_v35, %v1493_v32 }
 0x709   : > { %v1430_v55 = vpop.f32.mrf.mxu0 }
 0x70a   : > { %v1431_v56 = vadd.f32 %v1430_v55, %v1380_v5 }
 0x70b   : > { %v4336_v58 = vpop.f32.mrf.mxu0 }
 0x70c   : > { %v1437_v60 = vadd.f32 %v4545_v59, %v1431_v56  ;;  %v1475_v56 = vrot.slane %v4862_v54, %v4890_v52  ;;  %v1499_v54 = vld [vmem:[%s4659_s15 + $0xa0] sm:$0xff] }
 0x70d   : > { %v1433_v14 = vpop.f32.mrf.mxu0 }
 0x70e   : > { %v1434_v61 = vadd.f32 %v1433_v14, %v1380_v5  ;;  %v1439_v62 = vsel %vm504_vm2, %v1437_v60, 0.0  ;;  %v1481_v14 = vld [vmem:[%s4659_s15 + $0x10] sm:$0xff] }
 0x70f   : > { %1440 = vadd.xlane.f32.xlu0 %v1439_v62  ;;  %v4337_v63 = vpop.f32.mrf.mxu0  ;;  %v1482_v62 = vld [vmem:[%s4659_s15 + $0x18] sm:$0xff] }
 0x710   : > { %v1438_v21 = vadd.f32 %v4546_v0, %v1434_v61  ;;  %v1489_v61 = vld [vmem:[%s4659_s15 + $0x50] sm:$0xff]  ;;  %v1490_v63 = vld [vmem:[%s4659_s15 + $0x58] sm:$0xff] }
 0x712   : > { %v1442_v1 = vsel %vm504_vm2, %v1438_v21, 0.0 }
 0x713   : > { %1443 = vadd.xlane.f32.xlu0 %v1442_v1 }
 0x798   : > { %v1441_v29 = vpop.xlane.xlu0 %1440 }
 0x799   : > { %v1446_v2 = vmul.f32 0.03125, %v1441_v29  ;;  %v3866_v29 = vcombine.high %v1481_v14, %v1489_v61 }
 0x79b   : > { %v1448_v3 = vsub.f32 %v1437_v60, %v1446_v2  ;;  %v3868_v2 = vcombine.high %v1482_v62, %v1490_v63 }
 0x79c   : > { %v1444_v4 = vpop.xlane.xlu0 %1443 }
 0x79d   : > { %v1447_v6 = vmul.f32 0.03125, %v1444_v4  ;;  %v1450_v30 = vmul.f32 %v1448_v3, %v1448_v3  ;;  %v1500_v4 = vld [vmem:[%s4659_s15 + $0xa8] sm:$0xff] }
 0x79f   : > { %v1449_v7 = vsub.f32 %v1438_v21, %v1447_v6  ;;  %v1452_v31 = vsel %vm504_vm2, %v1450_v30, 0.0  ;;  %v1508_v6 = vld [vmem:[%s4659_s15 + $0xe8] sm:$0xff]  ;;  %v3865_v30 = vcombine.low %v1481_v14, %v1489_v61  ;;  %v4390_v14 = vld [vmem:[%s4669_s27 + $0x20] sm:$0xff]  }
 0x7a0   : > { %1453 = vadd.xlane.f32.xlu0 %v1452_v31  ;;  %v3887_v22 = vcombine.low %v1500_v4, %v1508_v6  ;;  %v4391_v61 = vld [vmem:[%s4669_s27 + $0xa0] sm:$0xff]  }
 0x7a1   : > { %v1451_v8 = vmul.f32 %v1449_v7, %v1449_v7 }
 0x7a3   : > { %v1455_v9 = vsel %vm504_vm2, %v1451_v8, 0.0  ;;  %v3888_v8 = vcombine.high %v1500_v4, %v1508_v6  ;;  %v4399_v4 = vld [vmem:[%s4669_s27 + $0x90] sm:$0xff]   ;;  %v4400_v6 = vld [vmem:[%s4669_s27 + $0x48] sm:$0xff]  }
 0x7a4   : > { %1456 = vadd.xlane.f32.xlu0 %v1455_v9  ;;  %v1483_v9 = vld [vmem:[%s4659_s15 + $0x20] sm:$0xff] }
 0x7a5   : > { %v3870_v23 = vcombine.high %v1483_v9, %v1491_v12  ;;  %v3869_v28 = vcombine.low %v1483_v9, %v1491_v12  ;;  %v4405_v9 = vld [vmem:[%s4669_s27 + $0xc0] sm:$0xff]  }
 0x7a6   : > { %v4406_v12 = vld [vmem:[%s4669_s27] sm:$0xff]  }
 0x829   : > { %v1454_v44 = vpop.xlane.xlu0 %1453 }
 0x82a   : > { %v1458_v45 = vmul.f32 0.03125, %v1454_v44  ;;  %v3875_v44 = vcombine.low %v1486_v37, %v1494_v36 }
 0x82c   : > { %v1460_v46 = vadd.f32 1e-05, %v1458_v45  ;;  %v4376_v45 = vld [vmem:[%s4669_s27 + $0x78] sm:$0xff]  }
 0x82d   : > { %v1457_v47 = vpop.xlane.xlu0 %1456 }
 0x82e   : > { %4536 = vrsqrt.f32 %v1460_v46  ;;  %v1459_v48 = vmul.f32 0.03125, %v1457_v47  ;;  %v4377_v46 = vld [vmem:[%s4669_s27 + $0xf8] sm:$0xff]  }
 0x82f   : > { %v4378_v47 = vld [vmem:[%s4669_s27 + $0x38] sm:$0xff]  }
 0x830   : > { %v1461_v49 = vadd.f32 1e-05, %v1459_v48  ;;  %v4379_v48 = vld [vmem:[%s4669_s27 + $0xb8] sm:$0xff]  }
 0x832   : > { %4538 = vrsqrt.f32 %v1461_v49  ;;  %v4380_v49 = vld [vmem:[%s4669_s27 + $0x70] sm:$0xff]  }
 0x83b   : > { %v4537_v51 = vpop.eup %4536 }
 0x83c   : > { %v1464_v5 = vmul.f32 %v4537_v51, %v1448_v3  ;;  %v1507_v3 = vld [vmem:[%s4659_s15 + $0xe0] sm:$0xff]  ;;  %v4381_v51 = vld [vmem:[%s4669_s27 + $0xf0] sm:$0xff]  }
 0x83d   : > { %v3886_v31 = vcombine.high %v1499_v54, %v1507_v3  ;;  %v3885_v17 = vcombine.low %v1499_v54, %v1507_v3  ;;  %v4397_v54 = vld [vmem:[%s4669_s27 + $0xd0] sm:$0xff]  }
 0x83e   : > { %v1470_v58 = vmul.f32 %v1469_v18, %v1464_v5  ;;  %v4384_v5 = vld [vmem:[%s4669_s27 + $0x68] sm:$0xff]   ;;  %v4398_v3 = vld [vmem:[%s4669_s27 + $0x10] sm:$0xff]  }
 0x83f   : > { %v4539_v55 = vpop.eup %4538 }
 0x840   : > { %v1465_v59 = vmul.f32 %v4539_v55, %v1449_v7  ;;  %v4898_v0 = vadd.f32 %v1475_v56, %v1470_v58  ;;  %v3867_v7 = vcombine.low %v1482_v62, %v1490_v63  ;;  %v4385_v55 = vld [vmem:[%s4669_s27 + $0xe8] sm:$0xff]   ;;  %v4392_v62 = vld [vmem:[%s4669_s27 + $0x58] sm:$0xff]  }
 0x841   : > { %v4387_v58 = vld [vmem:[%s4669_s27 + $0xa8] sm:$0xff]   ;;  %v4393_v63 = vld [vmem:[%s4669_s27 + $0xd8] sm:$0xff]  }
 0x842   : > { %v1471_v60 = vmul.f32 %v1469_v18, %v1465_v59  ;;  %v4383_v18 = vld [vmem:[%s4669_s27 + $0xb0] sm:$0xff]   ;;  %v4388_v59 = vld [vmem:[%s4669_s27 + $0x60] sm:$0xff]  }
 0x844   : > { %v4900_v21 = vadd.f32 %v1475_v56, %v1471_v60  ;;  %v4386_v56 = vld [vmem:[%s4669_s27 + $0x28] sm:$0xff]   ;;  %v4389_v60 = vld [vmem:[%s4669_s27 + $0xe0] sm:$0xff]  }
 0x846   : > { %v4904_v1 = vpack.c.bf16 %v4900_v21, %v4898_v0 }
 0x848   : > { %3893 = vmatmul.mubr.msk.bf16.vlgmr.msra.gmra.mxu1 %vm504_vm2, %v4904_v1  ;;  %3894 = vmatmul.mubr.msk.bf16.vlgmr.msra.gmra.mxu0 %vm504_vm2, %v4904_v1 }
 0x849   : > { %1857 = vmatpush1.bf16.msra.mxu1 %v3881_v41  ;;  %1900 = vmatpush1.bf16.msra.mxu0 %v3883_v42  ;;  %v3874_v41 = vcombine.high %v1485_v35, %v1493_v32  ;;  %v3876_v42 = vcombine.high %v1486_v37, %v1494_v36  ;;  %v4990_v35 = vsub.s32 7, %v4684_v10 }
 0x84a   : > { %1858 = vmatprep.subr.bf16.mxu1 %v3866_v29  ;;  %1901 = vmatprep.subr.bf16.mxu0 %v3868_v2  ;;  %v4395_v29 = vld [vmem:[%s4669_s27 + $0x98] sm:$0xff]   ;;  %v4396_v2 = vld [vmem:[%s4669_s27 + $0x50] sm:$0xff]  }
 0x84b   : > { %1876 = vmatprep.mubr.bf16.mxu1 %v4565_v39  ;;  %1919 = vmatprep.mubr.bf16.mxu0 %v4565_v39 }
 0x84d   : > { %1859 = vmatpush1.bf16.msra.mxu1 %v3865_v30  ;;  %1902 = vmatpush1.bf16.msra.mxu0 %v3867_v7  ;;  %v4401_v30 = vld [vmem:[%s4669_s27 + $0xc8] sm:$0xff]  }
 0x84e   : > { %1942 = vmatprep.subr.bf16.mxu1 %v3886_v31  ;;  %1985 = vmatprep.subr.bf16.mxu0 %v3888_v8  ;;  %v4402_v7 = vld [vmem:[%s4669_s27 + $0x8] sm:$0xff]   ;;  %v4404_v8 = vld [vmem:[%s4669_s27 + $0x40] sm:$0xff]  }
 0x84f   : > { %v4403_v31 = vld [vmem:[%s4669_s27 + $0x88] sm:$0xff]  }
 0x850   : > { %3895 = vmatmul.mubr.msk.bf16.vlgmr.msra.gmra.mxu1 %vm504_vm2, %v4904_v1  ;;  %3896 = vmatmul.mubr.msk.bf16.vlgmr.msra.gmra.mxu0 %vm504_vm2, %v4904_v1 }
 0x851   : > { %1943 = vmatpush1.bf16.msra.mxu1 %v3885_v17  ;;  %1986 = vmatpush1.bf16.msra.mxu0 %v3887_v22  ;;  %v4409_v17 = vld [vmem:[%s4669_s27 + $0x1f8] sm:$0xff]   ;;  %v4979_v22 = vld [vmem:[%s4664_s18] sm:$0xff] }
 0x852   : > { %1944 = vmatprep.subr.bf16.mxu1 %v3870_v23  ;;  %1987 = vmatprep.subr.bf16.mxu0 %v3872_v24  ;;  %v1522_v25 = vrot.slane %v4979_v22, %v4688_v11  ;;  %v1530_v20 = vrot.slane %v4979_v22, %v4859_v53  ;;  %v1518_v19 = vrot.slane %v4979_v22, %v4696_v15 }
 0x853   : > { %1962 = vmatprep.mubr.bf16.mxu1 %v4565_v39  ;;  %2005 = vmatprep.mubr.bf16.mxu0 %v4565_v39  ;;  %v1526_v27 = vrot.slane %v4979_v22, %v4798_v57 }
 0x855   : > { %1945 = vmatpush1.bf16.msra.mxu1 %v3869_v28  ;;  %1988 = vmatpush1.bf16.msra.mxu0 %v3871_v33 }
 0x856   : > { %2028 = vmatprep.subr.bf16.mxu1 %v3890_v34  ;;  %2071 = vmatprep.subr.bf16.mxu0 %v3892_v26 }
 0x858   : > { %3897 = vmatmul.mubr.msk.bf16.vlgmr.msra.gmra.mxu1 %vm504_vm2, %v4904_v1  ;;  %3898 = vmatmul.mubr.msk.bf16.vlgmr.msra.gmra.mxu0 %vm504_vm2, %v4904_v1 }
 0x859   : > { %2029 = vmatpush1.bf16.msra.mxu1 %v3889_v40  ;;  %2072 = vmatpush1.bf16.msra.mxu0 %v3891_v38 }
 0x85a   : > { %2030 = vmatprep.subr.bf16.mxu1 %v3874_v41  ;;  %2073 = vmatprep.subr.bf16.mxu0 %v3876_v42 }
 0x85b   : > { %2048 = vmatprep.mubr.bf16.mxu1 %v4565_v39  ;;  %2091 = vmatprep.mubr.bf16.mxu0 %v4565_v39  ;;  %v4382_v39 = vld [vmem:[%s4669_s27 + $0x30] sm:$0xff]  }
 0x85d   : > { %2031 = vmatpush1.bf16.msra.mxu1 %v3873_v43  ;;  %2074 = vmatpush1.bf16.msra.mxu0 %v3875_v44 }
 0x85e   : > { %4081 = vmatprep.subr.bf16.mxu1 %v4376_v45  ;;  %4103 = vmatprep.subr.bf16.mxu0 %v4377_v46 }
 0x860   : > { %3899 = vmatmul.mubr.msk.bf16.vlgmr.msra.gmra.mxu1 %vm504_vm2, %v4904_v1  ;;  %3900 = vmatmul.mubr.msk.bf16.vlgmr.msra.gmra.mxu0 %vm504_vm2, %v4904_v1  ;;  %v4394_v1 = vld [vmem:[%s4669_s27 + $0x18] sm:$0xff]  }
 0x861   : > { %4082 = vmatpush3.bf16.msra.mxu1 %v4378_v47  ;;  %4104 = vmatpush3.bf16.msra.mxu0 %v4379_v48 }
 0x862   : > { %4083 = vmatprep.subr.bf16.mxu1 %v4380_v49  ;;  %4105 = vmatprep.subr.bf16.mxu0 %v4381_v51  ;;  %v1538_v51 = vrot.slane %v4979_v22, %v4890_v52 }
 0x865   : > { %4084 = vmatpush3.bf16.msra.mxu1 %v4382_v39  ;;  %4106 = vmatpush3.bf16.msra.mxu0 %v4383_v18  ;;  %v1546_v39 = vrot.slane %v4979_v22, %v4990_v35 }
 0x866   : > { %4085 = vmatprep.subr.bf16.mxu1 %v4384_v5  ;;  %4107 = vmatprep.subr.bf16.mxu0 %v4385_v55 }
 0x869   : > { %4086 = vmatpush3.bf16.msra.mxu1 %v4386_v56  ;;  %4108 = vmatpush3.bf16.msra.mxu0 %v4387_v58 }
 0x86a   : > { %4087 = vmatprep.subr.bf16.mxu1 %v4388_v59  ;;  %4109 = vmatprep.subr.bf16.mxu0 %v4389_v60 }
 0x86d   : > { %4088 = vmatpush3.bf16.msra.mxu1 %v4390_v14  ;;  %4110 = vmatpush3.bf16.msra.mxu0 %v4391_v61 }
 0x86e   : > { %4089 = vmatprep.subr.bf16.mxu1 %v4392_v62  ;;  %4111 = vmatprep.subr.bf16.mxu0 %v4393_v63  ;;  %v4410_v63 = vld [vmem:[%s4669_s27 + $0x138] sm:$0xff]  }
 0x871   : > { %4090 = vmatpush3.bf16.msra.mxu1 %v4394_v1  ;;  %4112 = vmatpush3.bf16.msra.mxu0 %v4395_v29  ;;  %v4411_v1 = vld [vmem:[%s4669_s27 + $0x1b8] sm:$0xff]  }
 0x872   : > { %4091 = vmatprep.subr.bf16.mxu1 %v4396_v2  ;;  %4113 = vmatprep.subr.bf16.mxu0 %v4397_v54 }
 0x875   : > { %4092 = vmatpush3.bf16.msra.mxu1 %v4398_v3  ;;  %4114 = vmatpush3.bf16.msra.mxu0 %v4399_v4  ;;  %v4412_v4 = vld [vmem:[%s4669_s27 + $0x170] sm:$0xff]  }
 0x876   : > { %4093 = vmatprep.subr.bf16.mxu1 %v4400_v6  ;;  %4115 = vmatprep.subr.bf16.mxu0 %v4401_v30  ;;  %v4413_v6 = vld [vmem:[%s4669_s27 + $0x1f0] sm:$0xff]  }
 0x879   : > { %4094 = vmatpush3.bf16.msra.mxu1 %v4402_v7  ;;  %4116 = vmatpush3.bf16.msra.mxu0 %v4403_v31 }
 0x87a   : > { %4095 = vmatprep.subr.bf16.mxu1 %v4404_v8  ;;  %4117 = vmatprep.subr.bf16.mxu0 %v4405_v9 }
 0x87d   : > { %4096 = vmatpush3.bf16.msra.mxu1 %v4406_v12  ;;  %4118 = vmatpush3.bf16.msra.mxu0 %v4407_v13  ;;  %v4414_v13 = vld [vmem:[%s4669_s27 + $0x130] sm:$0xff]  }
 0x87e   : > { %4125 = vmatprep.subr.bf16.mxu1 %v4408_v16  ;;  %4147 = vmatprep.subr.bf16.mxu0 %v4409_v17  ;;  %v4415_v16 = vld [vmem:[%s4669_s27 + $0x1b0] sm:$0xff]   ;;  %v4416_v17 = vld [vmem:[%s4669_s27 + $0x168] sm:$0xff]  }
 0x908   : > { %v1792_v23 = vpop.f32.mrf.mxu1  ;;  %v1835_v24 = vpop.f32.mrf.mxu0 }
 0x909   : > { %v1793_v38 = vadd.f32 %v1792_v23, %v1518_v19  ;;  %v1836_v41 = vadd.f32 %v1835_v24, %v1526_v27 }
 0x90a   : > { %v1794_v28 = vpop.f32.mrf.mxu1  ;;  %v1837_v33 = vpop.f32.mrf.mxu0 }
 0x90b   : > { %v1795_v32 = vadd.f32 %v1794_v28, %v1522_v25  ;;  %v1838_v37 = vadd.f32 %v1837_v33, %v1530_v20  ;;  %v2102_v58 = vmax.f32 %v1793_v38, 0.0  ;;  %v2104_v59 = vmax.f32 %v1836_v41, 0.0  ;;  %v4418_v33 = vld [vmem:[%s4669_s27 + $0x128] sm:$0xff]   ;;  %v4423_v38 = vld [vmem:[%s4669_s27 + $0x1a0] sm:$0xff]   ;;  %v4424_v41 = vld [vmem:[%s4669_s27 + $0x158] sm:$0xff]  }
 0x90c   : > { %v1796_v34 = vpop.f32.mrf.mxu1  ;;  %v1839_v26 = vpop.f32.mrf.mxu0 }
 0x90d   : > { %v1797_v36 = vadd.f32 %v1796_v34, %v1518_v19  ;;  %v1840_v40 = vadd.f32 %v1839_v26, %v1526_v27  ;;  %v2103_v18 = vmax.f32 %v1795_v32, 0.0  ;;  %v2105_v5 = vmax.f32 %v1838_v37, 0.0  ;;  %v4417_v19 = vld [vmem:[%s4669_s27 + $0x1e8] sm:$0xff]   ;;  %v4420_v26 = vld [vmem:[%s4669_s27 + $0x160] sm:$0xff]  }
 0x90e   : > { %v1798_v42 = vpop.f32.mrf.mxu1  ;;  %v1841_v43 = vpop.f32.mrf.mxu0  ;;  %v4419_v34 = vld [vmem:[%s4669_s27 + $0x1a8] sm:$0xff]   ;;  %v4421_v32 = vld [vmem:[%s4669_s27 + $0x1e0] sm:$0xff]  }
 0x90f   : > { %v1799_v44 = vadd.f32 %v1798_v42, %v1522_v25  ;;  %v1842_v45 = vadd.f32 %v1841_v43, %v1530_v20  ;;  %v2118_v46 = vmax.f32 %v1797_v36, 0.0  ;;  %v2120_v47 = vmax.f32 %v1840_v40, 0.0  ;;  %v4422_v36 = vld [vmem:[%s4669_s27 + $0x120] sm:$0xff]   ;;  %v4425_v42 = vld [vmem:[%s4669_s27 + $0x1d8] sm:$0xff]  }
 0x910   : > { %v4992_v48 = vpop.f32.mrf.mxu1  ;;  %v4994_v49 = vpop.f32.mrf.mxu0 }
 0x911   : > { %v2119_v55 = vmax.f32 %v1799_v44, 0.0  ;;  %v2121_v56 = vmax.f32 %v1842_v45, 0.0  ;;  %v2134_v29 = vpack.c.bf16 %v2118_v46, %v2102_v58  ;;  %v2136_v2 = vpack.c.bf16 %v2120_v47, %v2104_v59  ;;  %v4426_v44 = vld [vmem:[%s4669_s27 + $0x118] sm:$0xff]   ;;  %v4428_v47 = vld [vmem:[%s4669_s27 + $0x150] sm:$0xff]   ;;  %v4432_v58 = vld [vmem:[%s4669_s27 + $0x148] sm:$0xff]  }
 0x912   : > { %v1880_v60 = vpop.f32.mrf.mxu1  ;;  %v1923_v14 = vpop.f32.mrf.mxu0  ;;  %v4427_v46 = vld [vmem:[%s4669_s27 + $0x198] sm:$0xff]   ;;  %v4433_v59 = vld [vmem:[%s4669_s27 + $0x1c8] sm:$0xff]  }
 0x913   : > { %v2135_v61 = vpack.c.bf16 %v2119_v55, %v2103_v18  ;;  %v2137_v62 = vpack.c.bf16 %v2121_v56, %v2105_v5  ;;  %v1881_v30 = vadd.f32 %v1880_v60, %v1538_v51  ;;  %v1924_v7 = vadd.f32 %v1923_v14, %v1546_v39  ;;  %v4430_v5 = vld [vmem:[%s4669_s27 + $0x110] sm:$0xff]   ;;  %v5044_v14 = vld [vmem:[%s4664_s18 + $0x8] sm:$0xff] }
 0x914   : > { %v5002_v54 = vpop.f32.mrf.mxu1  ;;  %v5004_v3 = vpop.f32.mrf.mxu0  ;;  %v4431_v56 = vld [vmem:[%s4669_s27 + $0x190] sm:$0xff]   ;;  %v1534_v60 = vrot.slane %v4979_v22, %v4885_v50 }
 0x915   : > { %3210 = vmatprep.mubr.bf16.mxu1 %v2135_v61  ;;  %3251 = vmatprep.mubr.bf16.mxu0 %v2137_v62  ;;  %v2107_v23 = vmax.f32 %v1881_v30, 0.0  ;;  %v2109_v24 = vmax.f32 %v1924_v7, 0.0  ;;  %v4434_v62 = vld [vmem:[%s4669_s27 + $0x108] sm:$0xff]   ;;  %v4437_v30 = vld [vmem:[%s4669_s27 + $0x1c0] sm:$0xff]  }
 0x916   : > { %v1884_v31 = vpop.f32.mrf.mxu1  ;;  %v1927_v8 = vpop.f32.mrf.mxu0  ;;  %3211 = vmatmul.mubr.bf16.vlgmr.msra.gmra.mxu1 %v2134_v29  ;;  %3252 = vmatmul.mubr.bf16.vlgmr.msra.gmra.mxu0 %v2136_v2  ;;  %v4435_v2 = vld [vmem:[%s4669_s27 + $0x188] sm:$0xff]  }
 0x917   : > { %v1885_v9 = vadd.f32 %v1884_v31, %v1538_v51  ;;  %v1928_v12 = vadd.f32 %v1927_v8, %v1546_v39  ;;  %4126 = vmatpush3.bf16.msra.mxu1 %v4410_v63  ;;  %4148 = vmatpush3.bf16.msra.mxu0 %v4411_v1  ;;  %v4429_v51 = vld [vmem:[%s4669_s27 + $0x1d0] sm:$0xff]   ;;  %v5029_v39 = vsub.s32 6, %v4684_v10  ;;  %v1883_v63 = vadd.f32 %v5002_v54, %v1534_v60  ;;  %v4438_v8 = vld [vmem:[%s4669_s27 + $0x100] sm:$0xff]  }
 0x918   : > { %4127 = vmatprep.subr.bf16.mxu1 %v4412_v4  ;;  %4149 = vmatprep.subr.bf16.mxu0 %v4413_v6  ;;  %v5016_v37 = vpop.f32.mrf.mxu1  ;;  %v5019_v40 = vpop.f32.mrf.mxu0  ;;  %v1554_v1 = vrot.slane %v5044_v14, %v4688_v11  ;;  %v4436_v4 = vld [vmem:[%s4669_s27 + $0x140] sm:$0xff]   ;;  %v1562_v6 = vrot.slane %v5044_v14, %v4859_v53  ;;  %v1879_v54 = vadd.f32 %v4992_v48, %v1534_v60  ;;  %v4457_v60 = vld [vmem:[%s4669_s27 + $0x2d8] sm:$0xff]  }
 0x919   : > { %v2123_v25 = vmax.f32 %v1885_v9, 0.0  ;;  %v2125_v20 = vmax.f32 %v1928_v12, 0.0  ;;  %v1542_v10 = vrot.slane %v4979_v22, %v5029_v39  ;;  %v2122_v9 = vmax.f32 %v1883_v63, 0.0  ;;  %v4459_v63 = vld [vmem:[%s4669_s27 + $0x298] sm:$0xff]  }
 0x91a   : > { %v1966_v43 = vpop.f32.mrf.mxu1  ;;  %v2009_v45 = vpop.f32.mrf.mxu0  ;;  %v2106_v48 = vmax.f32 %v1879_v54, 0.0  ;;  %v4465_v54 = vld [vmem:[%s4669_s27 + $0x2c8] sm:$0xff]  }
 0x91b   : > { %v2139_v27 = vpack.c.bf16 %v2123_v25, %v2107_v23  ;;  %v2141_v28 = vpack.c.bf16 %v2125_v20, %v2109_v24  ;;  %4128 = vmatpush3.bf16.msra.mxu1 %v4414_v13  ;;  %4150 = vmatpush3.bf16.msra.mxu0 %v4415_v16  ;;  %v1926_v22 = vadd.f32 %v5004_v3, %v1542_v10  ;;  %v4439_v3 = vld [vmem:[%s4669_s27 + $0x180] sm:$0xff]   ;;  %v4440_v13 = vld [vmem:[%s4669_s27 + $0x278] sm:$0xff]  }
 0x91c   : > { %4129 = vmatprep.subr.bf16.mxu1 %v4416_v17  ;;  %4151 = vmatprep.subr.bf16.mxu0 %v4417_v19  ;;  %v5031_v18 = vpop.f32.mrf.mxu1  ;;  %v5034_v55 = vpop.f32.mrf.mxu0  ;;  %v1922_v11 = vadd.f32 %v4994_v49, %v1542_v10  ;;  %v1967_v12 = vadd.f32 %v1966_v43, %v1554_v1  ;;  %v2010_v16 = vadd.f32 %v2009_v45, %v1562_v6  ;;  %v4441_v17 = vld [vmem:[%s4669_s27 + $0x2f8] sm:$0xff]   ;;  %v4449_v43 = vld [vmem:[%s4669_s27 + $0x2e8] sm:$0xff]  }
 0x91d   : > { %3292 = vmatprep.mubr.bf16.mxu1 %v2139_v27  ;;  %3333 = vmatprep.mubr.bf16.mxu0 %v2141_v28  ;;  %v2124_v53 = vmax.f32 %v1926_v22, 0.0  ;;  %v4442_v25 = vld [vmem:[%s4669_s27 + $0x238] sm:$0xff]   ;;  %v2138_v20 = vpack.c.bf16 %v2122_v9, %v2106_v48  ;;  %v4451_v45 = vld [vmem:[%s4669_s27 + $0x2a8] sm:$0xff]  }
 0x91e   : > { %v1970_v61 = vpop.f32.mrf.mxu1  ;;  %v2013_v29 = vpop.f32.mrf.mxu0  ;;  %v2108_v49 = vmax.f32 %v1922_v11, 0.0  ;;  %v2111_v19 = vmax.f32 %v1967_v12, 0.0  ;;  %v4443_v27 = vld [vmem:[%s4669_s27 + $0x2b8] sm:$0xff]   ;;  %v1558_v11 = vrot.slane %v5044_v14, %v4798_v57  ;;  %v1570_v12 = vrot.slane %v5044_v14, %v4890_v52 }
 0x91f   : > { %4130 = vmatpush3.bf16.msra.mxu1 %v4418_v33  ;;  %4152 = vmatpush3.bf16.msra.mxu0 %v4419_v34  ;;  %v1971_v7 = vadd.f32 %v1970_v61, %v1554_v1  ;;  %v2014_v31 = vadd.f32 %v2013_v29, %v1562_v6  ;;  %v2113_v33 = vmax.f32 %v2010_v16, 0.0  ;;  %v4444_v34 = vld [vmem:[%s4669_s27 + $0x270] sm:$0xff]   ;;  %v4458_v61 = vld [vmem:[%s4669_s27 + $0x218] sm:$0xff]   ;;  %v1578_v57 = vrot.slane %v5044_v14, %v4990_v35  ;;  %v4469_v16 = vld [vmem:[%s4669_s27 + $0x2c0] sm:$0xff]  }
 0x920   : > { %4131 = vmatprep.subr.bf16.mxu1 %v4420_v26  ;;  %4153 = vmatprep.subr.bf16.mxu0 %v4421_v32  ;;  %v2140_v28 = vpack.c.bf16 %v2124_v53, %v2108_v49  ;;  %v4445_v32 = vld [vmem:[%s4669_s27 + $0x2f0] sm:$0xff]   ;;  %v4468_v53 = vld [vmem:[%s4669_s27 + $0x240] sm:$0xff]   ;;  %v2008_v52 = vadd.f32 %v5019_v40, %v1558_v11 }
 0x921   : > { %v2127_v23 = vmax.f32 %v1971_v7, 0.0  ;;  %v2129_v24 = vmax.f32 %v2014_v31, 0.0  ;;  %v4460_v1 = vld [vmem:[%s4669_s27 + $0x250] sm:$0xff]   ;;  %v1550_v7 = vrot.slane %v5044_v14, %v4696_v15  ;;  %v2012_v15 = vadd.f32 %v5034_v55, %v1558_v11  ;;  %v4471_v55 = vld [vmem:[%s4669_s27 + $0x280] sm:$0xff]  }
 0x922   : > { %v4461_v29 = vld [vmem:[%s4669_s27 + $0x2d0] sm:$0xff]   ;;  %v2112_v40 = vmax.f32 %v2008_v52, 0.0  ;;  %v4503_v52 = vld [vmem:[%s4669_s27 + $0x380] sm:$0xff]  }
 0x923   : > { %4132 = vmatpush3.bf16.msra.mxu1 %v4422_v36  ;;  %4154 = vmatpush3.bf16.msra.mxu0 %v4423_v38  ;;  %v2143_v26 = vpack.c.bf16 %v2127_v23, %v2111_v19  ;;  %v2145_v36 = vpack.c.bf16 %v2129_v24, %v2113_v33  ;;  %v4446_v38 = vld [vmem:[%s4669_s27 + $0x230] sm:$0xff]   ;;  %v1969_v9 = vadd.f32 %v5031_v18, %v1550_v7  ;;  %v4470_v23 = vld [vmem:[%s4669_s27 + $0x200] sm:$0xff]  }
 0x924   : > { %4133 = vmatprep.subr.bf16.mxu1 %v4424_v41  ;;  %4155 = vmatprep.subr.bf16.mxu0 %v4425_v42  ;;  %v4447_v41 = vld [vmem:[%s4669_s27 + $0x2b0] sm:$0xff]   ;;  %v4448_v42 = vld [vmem:[%s4669_s27 + $0x268] sm:$0xff]   ;;  %v1965_v18 = vadd.f32 %v5016_v37, %v1550_v7 }
 0x925   : > { %v4463_v6 = vld [vmem:[%s4669_s27 + $0x290] sm:$0xff]   ;;  %v2126_v49 = vmax.f32 %v1969_v9, 0.0  ;;  %v1566_v9 = vrot.slane %v5044_v14, %v4885_v50 }
 0x926   : > { %v2110_v37 = vmax.f32 %v1965_v18, 0.0  ;;  %v4494_v7 = vld [vmem:[%s4669_s27 + $0x310] sm:$0xff]  }
 0x927   : > { %4134 = vmatpush3.bf16.msra.mxu1 %v4426_v44  ;;  %4156 = vmatpush3.bf16.msra.mxu0 %v4427_v46  ;;  %v4450_v44 = vld [vmem:[%s4669_s27 + $0x228] sm:$0xff]   ;;  %v4452_v46 = vld [vmem:[%s4669_s27 + $0x260] sm:$0xff]   ;;  %v4495_v11 = vld [vmem:[%s4669_s27 + $0x390] sm:$0xff]  }
 0x928   : > { %4135 = vmatprep.subr.bf16.mxu1 %v4428_v47  ;;  %4157 = vmatprep.subr.bf16.mxu0 %v4429_v51  ;;  %v4453_v47 = vld [vmem:[%s4669_s27 + $0x2e0] sm:$0xff]   ;;  %v5074_v51 = vpop.f32.mrf.mxu1 }
 0x929   : > { %v2051_v18 = vadd.f32 %v5074_v51, %v1566_v9 }
 0x92a   : > { %v2052_v10 = vpop.f32.mrf.mxu1 }
 0x92b   : > { %4136 = vmatpush3.bf16.msra.mxu1 %v4430_v5  ;;  %4158 = vmatpush3.bf16.msra.mxu0 %v4431_v56  ;;  %v4454_v5 = vld [vmem:[%s4669_s27 + $0x220] sm:$0xff]   ;;  %v5077_v56 = vpop.f32.mrf.mxu0  ;;  %v2053_v24 = vadd.f32 %v2052_v10, %v1570_v12 }
 0x92c   : > { %4137 = vmatprep.subr.bf16.mxu1 %v4432_v58  ;;  %4159 = vmatprep.subr.bf16.mxu0 %v4433_v59  ;;  %v4455_v58 = vld [vmem:[%s4669_s27 + $0x2a0] sm:$0xff]   ;;  %v4456_v59 = vld [vmem:[%s4669_s27 + $0x258] sm:$0xff]  }
 0x92d   : > { %v4484_v10 = vld [vmem:[%s4669_s27 + $0x360] sm:$0xff]  }
 0x92f   : > { %4138 = vmatpush3.bf16.msra.mxu1 %v4434_v62  ;;  %4160 = vmatpush3.bf16.msra.mxu0 %v4435_v2  ;;  %v2095_v62 = vpop.f32.mrf.mxu0  ;;  %v5086_v2 = vpop.f32.mrf.mxu1 }
 0x930   : > { %4139 = vmatprep.subr.bf16.mxu1 %v4436_v4  ;;  %4161 = vmatprep.subr.bf16.mxu0 %v4437_v30  ;;  %v4462_v4 = vld [vmem:[%s4669_s27 + $0x210] sm:$0xff]   ;;  %v4464_v30 = vld [vmem:[%s4669_s27 + $0x248] sm:$0xff]   ;;  %v2096_v19 = vadd.f32 %v2095_v62, %v1578_v57  ;;  %v4486_v62 = vld [vmem:[%s4669_s27 + $0x320] sm:$0xff]  }
 0x931   : > { %v5089_v22 = vpop.f32.mrf.mxu0  ;;  %v2056_v31 = vpop.f32.mrf.mxu1 }
 0x933   : > { %4140 = vmatpush3.bf16.msra.mxu1 %v4438_v8  ;;  %4162 = vmatpush3.bf16.msra.mxu0 %v4439_v3  ;;  %v4466_v8 = vld [vmem:[%s4669_s27 + $0x208] sm:$0xff]   ;;  %v2099_v3 = vpop.f32.mrf.mxu0 }
 0x934   : > { %4169 = vmatprep.subr.bf16.mxu1 %v4440_v13  ;;  %4191 = vmatprep.subr.bf16.mxu0 %v4441_v17  ;;  %v4467_v13 = vld [vmem:[%s4669_s27 + $0x288] sm:$0xff]   ;;  %v2057_v17 = vadd.f32 %v2056_v31, %v1570_v12  ;;  %v2100_v48 = vadd.f32 %v2099_v3, %v1578_v57  ;;  %v1574_v12 = vrot.slane %v5044_v14, %v5029_v39 }
 0x935   : > { %v4496_v31 = vld [vmem:[%s4669_s27 + $0x348] sm:$0xff]  }
 0x936   : > { %3293 = vmatmul.mubr.bf16.vlgmr.msra.gmra.mxu1 %v2138_v20  ;;  %3334 = vmatmul.mubr.bf16.vlgmr.msra.gmra.mxu0 %v2140_v28  ;;  %v2128_v20 = vmax.f32 %v2012_v15, 0.0  ;;  %v2131_v28 = vmax.f32 %v2057_v17, 0.0  ;;  %v2133_v33 = vmax.f32 %v2100_v48, 0.0  ;;  %v4498_v3 = vld [vmem:[%s4669_s27 + $0x308] sm:$0xff]   ;;  %v4500_v15 = vld [vmem:[%s4669_s27 + $0x340] sm:$0xff]   ;;  %v2098_v57 = vadd.f32 %v5089_v22, %v1574_v12 }
 0x937   : > { %4170 = vmatpush3.bf16.msra.mxu1 %v4442_v25  ;;  %3374 = vmatprep.mubr.bf16.mxu1 %v2143_v26  ;;  %v4472_v25 = vld [vmem:[%s4669_s27 + $0x378] sm:$0xff]   ;;  %v2142_v26 = vpack.c.bf16 %v2126_v49, %v2110_v37  ;;  %v2094_v50 = vadd.f32 %v5077_v56, %v1574_v12  ;;  %v4502_v17 = vld [vmem:[%s4669_s27 + $0x300] sm:$0xff]  }
 0x938   : > { %4192 = vmatpush3.bf16.msra.mxu0 %v4443_v27  ;;  %3415 = vmatprep.mubr.bf16.mxu0 %v2145_v36  ;;  %v4473_v27 = vld [vmem:[%s4669_s27 + $0x3f8] sm:$0xff]   ;;  %v2132_v48 = vmax.f32 %v2098_v57, 0.0 }
 0x939   : > { %4171 = vmatprep.subr.bf16.mxu1 %v4444_v34  ;;  %4193 = vmatprep.subr.bf16.mxu0 %v4445_v32  ;;  %v4474_v34 = vld [vmem:[%s4669_s27 + $0x338] sm:$0xff]   ;;  %v2115_v32 = vmax.f32 %v2053_v24, 0.0 }
 0x93a   : > { %v4475_v36 = vld [vmem:[%s4669_s27 + $0x3b8] sm:$0xff]  }
 0x93b   : > { %4172 = vmatpush3.bf16.msra.mxu1 %v4446_v38  ;;  %v2144_v38 = vpack.c.bf16 %v2128_v20, %v2112_v40 }
 0x93c   : > { %4194 = vmatpush3.bf16.msra.mxu0 %v4447_v41  ;;  %4173 = vmatprep.subr.bf16.mxu1 %v4448_v42  ;;  %v2117_v41 = vmax.f32 %v2096_v19, 0.0  ;;  %v4476_v42 = vld [vmem:[%s4669_s27 + $0x370] sm:$0xff]  }
 0x93d   : > { %4195 = vmatprep.subr.bf16.mxu0 %v4449_v43  ;;  %v2147_v43 = vpack.c.bf16 %v2131_v28, %v2115_v32 }
 0x93f   : > { %4174 = vmatpush3.bf16.msra.mxu1 %v4450_v44  ;;  %v4477_v44 = vld [vmem:[%s4669_s27 + $0x3f0] sm:$0xff]  }
 0x940   : > { %4196 = vmatpush3.bf16.msra.mxu0 %v4451_v45  ;;  %4175 = vmatprep.subr.bf16.mxu1 %v4452_v46  ;;  %v2149_v45 = vpack.c.bf16 %v2133_v33, %v2117_v41  ;;  %v4478_v46 = vld [vmem:[%s4669_s27 + $0x330] sm:$0xff]  }
 0x941   : > { %4197 = vmatprep.subr.bf16.mxu0 %v4453_v47  ;;  %v4479_v47 = vld [vmem:[%s4669_s27 + $0x3b0] sm:$0xff]  }
 0x943   : > { %4176 = vmatpush3.bf16.msra.mxu1 %v4454_v5  ;;  %v4480_v5 = vld [vmem:[%s4669_s27 + $0x368] sm:$0xff]  }
 0x944   : > { %4198 = vmatpush3.bf16.msra.mxu0 %v4455_v58  ;;  %4177 = vmatprep.subr.bf16.mxu1 %v4456_v59  ;;  %v4481_v58 = vld [vmem:[%s4669_s27 + $0x3e8] sm:$0xff]  }
 0x945   : > { %4199 = vmatprep.subr.bf16.mxu0 %v4457_v60  ;;  %v4482_v59 = vld [vmem:[%s4669_s27 + $0x328] sm:$0xff]  }
 0x946   : > { %v4483_v60 = vld [vmem:[%s4669_s27 + $0x3a8] sm:$0xff]  }
 0x947   : > { %4178 = vmatpush3.bf16.msra.mxu1 %v4458_v61  ;;  %v4485_v61 = vld [vmem:[%s4669_s27 + $0x3e0] sm:$0xff]  }
 0x948   : > { %4200 = vmatpush3.bf16.msra.mxu0 %v4459_v63  ;;  %4179 = vmatprep.subr.bf16.mxu1 %v4460_v1  ;;  %v4487_v63 = vld [vmem:[%s4669_s27 + $0x3a0] sm:$0xff]   ;;  %v4488_v1 = vld [vmem:[%s4669_s27 + $0x358] sm:$0xff]  }
 0x949   : > { %4201 = vmatprep.subr.bf16.mxu0 %v4461_v29  ;;  %v4489_v29 = vld [vmem:[%s4669_s27 + $0x3d8] sm:$0xff]  }
 0x94b   : > { %4180 = vmatpush3.bf16.msra.mxu1 %v4462_v4  ;;  %v4490_v4 = vld [vmem:[%s4669_s27 + $0x318] sm:$0xff]  }
 0x94c   : > { %4202 = vmatpush3.bf16.msra.mxu0 %v4463_v6  ;;  %4181 = vmatprep.subr.bf16.mxu1 %v4464_v30  ;;  %v4491_v6 = vld [vmem:[%s4669_s27 + $0x398] sm:$0xff]   ;;  %v4492_v30 = vld [vmem:[%s4669_s27 + $0x350] sm:$0xff]  }
 0x94d   : > { %4203 = vmatprep.subr.bf16.mxu0 %v4465_v54  ;;  %v4493_v54 = vld [vmem:[%s4669_s27 + $0x3d0] sm:$0xff]  }
 0x94f   : > { %4182 = vmatpush3.bf16.msra.mxu1 %v4466_v8  ;;  %v4497_v8 = vld [vmem:[%s4669_s27 + $0x3c8] sm:$0xff]  }
 0x950   : > { %4204 = vmatpush3.bf16.msra.mxu0 %v4467_v13  ;;  %4183 = vmatprep.subr.bf16.mxu1 %v4468_v53  ;;  %v2055_v13 = vadd.f32 %v5086_v2, %v1566_v9  ;;  %v4499_v53 = vld [vmem:[%s4669_s27 + $0x388] sm:$0xff]   ;;  %v2114_v2 = vmax.f32 %v2051_v18, 0.0 }
 0x951   : > { %4205 = vmatprep.subr.bf16.mxu0 %v4469_v16  ;;  %v4501_v16 = vld [vmem:[%s4669_s27 + $0x3c0] sm:$0xff]  }
 0x952   : > { %v2130_v14 = vmax.f32 %v2055_v13, 0.0 }
 0x953   : > { %4184 = vmatpush3.bf16.msra.mxu1 %v4470_v23  ;;  %v2116_v23 = vmax.f32 %v2094_v50, 0.0 }
 0x954   : > { %4206 = vmatpush3.bf16.msra.mxu0 %v4471_v55  ;;  %4213 = vmatprep.subr.bf16.mxu1 %v4472_v25  ;;  %v2146_v49 = vpack.c.bf16 %v2130_v14, %v2114_v2 }
 0x955   : > { %4235 = vmatprep.subr.bf16.mxu0 %v4473_v27  ;;  %v2148_v22 = vpack.c.bf16 %v2132_v48, %v2116_v23 }
 0x956   : > { %3375 = vmatmul.mubr.bf16.vlgmr.msra.gmra.mxu1 %v2142_v26 }
 0x957   : > { %3416 = vmatmul.mubr.bf16.vlgmr.msra.gmra.mxu0 %v2144_v38  ;;  %4214 = vmatpush3.bf16.msra.mxu1 %v4474_v34 }
 0x958   : > { %3456 = vmatprep.mubr.bf16.mxu1 %v2147_v43  ;;  %4236 = vmatpush3.bf16.msra.mxu0 %v4475_v36  ;;  %v5153_v36 = vld [vmem:[%s4649_s28] sm:$0xff] }
 0x959   : > { %3497 = vmatprep.mubr.bf16.mxu0 %v2149_v45  ;;  %4215 = vmatprep.subr.bf16.mxu1 %v4476_v42  ;;  %v2409_v38 = vrot.slane %v5153_v36, %v5029_v39 }
 0x95a   : > { %4237 = vmatprep.subr.bf16.mxu0 %v4477_v44 }
 0x95b   : > { %4216 = vmatpush3.bf16.msra.mxu1 %v4478_v46 }
 0x95c   : > { %4238 = vmatpush3.bf16.msra.mxu0 %v4479_v47  ;;  %4217 = vmatprep.subr.bf16.mxu1 %v4480_v5 }
 0x95d   : > { %4239 = vmatprep.subr.bf16.mxu0 %v4481_v58 }
 0x95f   : > { %4218 = vmatpush3.bf16.msra.mxu1 %v4482_v59 }
 0x960   : > { %4240 = vmatpush3.bf16.msra.mxu0 %v4483_v60  ;;  %4219 = vmatprep.subr.bf16.mxu1 %v4484_v10 }
 0x961   : > { %4241 = vmatprep.subr.bf16.mxu0 %v4485_v61 }
 0x963   : > { %4220 = vmatpush3.bf16.msra.mxu1 %v4486_v62 }
 0x964   : > { %4242 = vmatpush3.bf16.msra.mxu0 %v4487_v63  ;;  %4221 = vmatprep.subr.bf16.mxu1 %v4488_v1 }
 0x965   : > { %4243 = vmatprep.subr.bf16.mxu0 %v4489_v29 }
 0x967   : > { %4222 = vmatpush3.bf16.msra.mxu1 %v4490_v4 }
 0x968   : > { %4244 = vmatpush3.bf16.msra.mxu0 %v4491_v6  ;;  %4223 = vmatprep.subr.bf16.mxu1 %v4492_v30 }
 0x969   : > { %4245 = vmatprep.subr.bf16.mxu0 %v4493_v54 }
 0x96b   : > { %4224 = vmatpush3.bf16.msra.mxu1 %v4494_v7 }
 0x96c   : > { %4246 = vmatpush3.bf16.msra.mxu0 %v4495_v11  ;;  %4225 = vmatprep.subr.bf16.mxu1 %v4496_v31 }
 0x96d   : > { %4247 = vmatprep.subr.bf16.mxu0 %v4497_v8 }
 0x96f   : > { %4226 = vmatpush3.bf16.msra.mxu1 %v4498_v3 }
 0x970   : > { %4248 = vmatpush3.bf16.msra.mxu0 %v4499_v53  ;;  %4227 = vmatprep.subr.bf16.mxu1 %v4500_v15 }
 0x971   : > { %4249 = vmatprep.subr.bf16.mxu0 %v4501_v16 }
 0x973   : > { %4228 = vmatpush3.bf16.msra.mxu1 %v4502_v17 }
 0x974   : > { %4250 = vmatpush3.bf16.msra.mxu0 %v4503_v52 }
 0x976   : > { %3457 = vmatmul.mubr.bf16.vlgmr.msra.gmra.mxu1 %v2146_v49 }
 0x977   : > { %3498 = vmatmul.mubr.bf16.vlgmr.msra.gmra.mxu0 %v2148_v22 }
 0x9d6   : > { %v4097_v51 = vpop.f32.mrf.mxu1  ;;  %v4119_v24 = vpop.f32.mrf.mxu0 }
 0x9d8   : > { %v4098_v56 = vpop.f32.mrf.mxu1  ;;  %v4120_v55 = vpop.f32.mrf.mxu0 }
 0x9d9   : > { %v4099_v41 = vadd.f32 %v4098_v56, %v4097_v51  ;;  %v4121_v5 = vadd.f32 %v4120_v55, %v4119_v24 }
 0x9da   : > { %v4100_v25 = vpop.f32.mrf.mxu1  ;;  %v4122_v20 = vpop.f32.mrf.mxu0 }
 0x9db   : > { %v3213_v44 = vadd.f32 %v4099_v41, %v2409_v38 }
 0x9dc   : > { %v4101_v19 = vpop.f32.mrf.mxu1  ;;  %v4123_v37 = vpop.f32.mrf.mxu0 }
 0x9dd   : > { %v4102_v45 = vadd.f32 %v4101_v19, %v4100_v25  ;;  %v3254_v59 = vadd.f32 %v4121_v5, %v3213_v44  ;;  %v4124_v62 = vadd.f32 %v4123_v37, %v4122_v20  ;;  %v3537_v5 = vrot.slane %v5153_v36, %v4990_v35 }
 0x9df   : > { %v3216_v60 = vadd.f32 %v4102_v45, %v2409_v38 }
 0x9e1   : > { %v3257_v29 = vadd.f32 %v4124_v62, %v3216_v60  ;;  %v4029_v60 = vld [vmem:[%s4649_s28 + $0x8] ss:$0 sm:$0xff] }
 0x9f6   : > { %v4141_v27 = vpop.f32.mrf.mxu1  ;;  %v4163_v28 = vpop.f32.mrf.mxu0 }
 0x9f8   : > { %v4142_v40 = vpop.f32.mrf.mxu1  ;;  %v4164_v33 = vpop.f32.mrf.mxu0 }
 0x9f9   : > { %v4143_v58 = vadd.f32 %v4142_v40, %v4141_v27  ;;  %v4165_v4 = vadd.f32 %v4164_v33, %v4163_v28 }
 0x9fa   : > { %v4144_v34 = vpop.f32.mrf.mxu1  ;;  %v4166_v26 = vpop.f32.mrf.mxu0 }
 0x9fb   : > { %v3295_v63 = vadd.f32 %v4143_v58, %v3254_v59 }
 0x9fc   : > { %v4145_v32 = vpop.f32.mrf.mxu1  ;;  %v4167_v43 = vpop.f32.mrf.mxu0 }
 0x9fd   : > { %v4146_v1 = vadd.f32 %v4145_v32, %v4144_v34  ;;  %v3336_v54 = vadd.f32 %v4165_v4, %v3295_v63  ;;  %v4168_v11 = vadd.f32 %v4167_v43, %v4166_v26 }
 0x9ff   : > { %v3298_v7 = vadd.f32 %v4146_v1, %v3257_v29 }
 0xa01   : > { %v3339_v3 = vadd.f32 %v4168_v11, %v3298_v7 }
 0xa16   : > { %v4185_v42 = vpop.f32.mrf.mxu1 }
 0xa17   : > { %v4207_v46 = vpop.f32.mrf.mxu0 }
 0xa18   : > { %v4186_v47 = vpop.f32.mrf.mxu1 }
 0xa19   : > { %v4208_v10 = vpop.f32.mrf.mxu0  ;;  %v4187_v6 = vadd.f32 %v4186_v47, %v4185_v42 }
 0xa1a   : > { %v4188_v61 = vpop.f32.mrf.mxu1  ;;  %v4209_v13 = vadd.f32 %v4208_v10, %v4207_v46 }
 0xa1b   : > { %v4210_v39 = vpop.f32.mrf.mxu0  ;;  %v3377_v31 = vadd.f32 %v4187_v6, %v3336_v54 }
 0xa1c   : > { %v4189_v30 = vpop.f32.mrf.mxu1 }
 0xa1d   : > { %v4190_v8 = vadd.f32 %v4189_v30, %v4188_v61  ;;  %v4211_v9 = vpop.f32.mrf.mxu0  ;;  %v3418_v57 = vadd.f32 %v4209_v13, %v3377_v31 }
 0xa1e   : > { %v4212_v14 = vadd.f32 %v4211_v9, %v4210_v39 }
 0xa1f   : > { %v3380_v16 = vadd.f32 %v4190_v8, %v3339_v3 }
 0xa21   : > { %v3421_v49 = vadd.f32 %v4212_v14, %v3380_v16 }
 0xa36   : > { %v4229_v12 = vpop.f32.mrf.mxu1 }
 0xa37   : > { %v4251_v53 = vpop.f32.mrf.mxu0 }
 0xa38   : > { %v4230_v15 = vpop.f32.mrf.mxu1 }
 0xa39   : > { %v4231_v18 = vadd.f32 %v4230_v15, %v4229_v12  ;;  %v4252_v50 = vpop.f32.mrf.mxu0 }
 0xa3a   : > { %v4232_v17 = vpop.f32.mrf.mxu1  ;;  %v4253_v48 = vadd.f32 %v4252_v50, %v4251_v53 }
 0xa3b   : > { %v3459_v52 = vadd.f32 %v4231_v18, %v3418_v57  ;;  %v4254_v2 = vpop.f32.mrf.mxu0 }
 0xa3c   : > { %v4233_v23 = vpop.f32.mrf.mxu1 }
 0xa3d   : > { %v3500_v22 = vadd.f32 %v4253_v48, %v3459_v52  ;;  %v4234_v51 = vadd.f32 %v4233_v23, %v4232_v17  ;;  %v4255_v24 = vpop.f32.mrf.mxu0 }
 0xa3e   : > { %v4256_v55 = vadd.f32 %v4255_v24, %v4254_v2 }
 0xa3f   : > { %v3462_v56 = vadd.f32 %v4234_v51, %v3421_v49  ;;  %v3506_v25 = vadd.f32 %v3500_v22, %v4898_v0 }
 0xa41   : > { %v3503_v20 = vadd.f32 %v4256_v55, %v3462_v56  ;;  %v3508_v19 = vsel %vm504_vm2, %v3506_v25, 0.0 }
 0xa42   : > { %3509 = vadd.xlane.f32.xlu1 %v3508_v19 }
 0xa43   : > { %v3507_v27 = vadd.f32 %v3503_v20, %v4900_v21 }
 0xa45   : > { %v3511_v37 = vsel %vm504_vm2, %v3507_v27, 0.0 }
 0xa46   : > { %3512 = vadd.xlane.f32.xlu0 %v3511_v37 }
 0xacb   : > { %v3510_v28 = vpop.xlane.xlu1 %3509 }
 0xacc   : > { %v3514_v40 = vmul.f32 0.03125, %v3510_v28 }
 0xace   : > { %v3516_v33 = vsub.f32 %v3506_v25, %v3514_v40 }
 0xacf   : > { %v3513_v34 = vpop.xlane.xlu0 %3512 }
 0xad0   : > { %v3515_v26 = vmul.f32 0.03125, %v3513_v34  ;;  %v3518_v32 = vmul.f32 %v3516_v33, %v3516_v33 }
 0xad2   : > { %v3517_v38 = vsub.f32 %v3507_v27, %v3515_v26  ;;  %v3520_v41 = vsel %vm504_vm2, %v3518_v32, 0.0 }
 0xad3   : > { %3521 = vadd.xlane.f32.xlu1 %v3520_v41 }
 0xad4   : > { %v3519_v0 = vmul.f32 %v3517_v38, %v3517_v38 }
 0xad6   : > { %v3523_v42 = vsel %vm504_vm2, %v3519_v0, 0.0 }
 0xad7   : > { %3524 = vadd.xlane.f32.xlu0 %v3523_v42 }
 0xb5c   : > { %v3522_v43 = vpop.xlane.xlu1 %3521 }
 0xb5d   : > { %v3526_v21 = vmul.f32 0.03125, %v3522_v43 }
 0xb5f   : > { %v3528_v44 = vadd.f32 1e-05, %v3526_v21 }
 0xb60   : > { %v3525_v45 = vpop.xlane.xlu0 %3524 }
 0xb61   : > { %4540 = vrsqrt.f32 %v3528_v44  ;;  %v3527_v46 = vmul.f32 0.03125, %v3525_v45 }
 0xb63   : > { %v3529_v47 = vadd.f32 1e-05, %v3527_v46 }
 0xb65   : > { %4542 = vrsqrt.f32 %v3529_v47 }
 0xb6e   : > { %v4541_v58 = vpop.eup %4540 }
 0xb6f   : > { %v3532_v59 = vmul.f32 %v4541_v58, %v3516_v33 }
 0xb71   : > { %v3538_v10 = vmul.f32 %v3537_v5, %v3532_v59 }
 0xb72   : > { %v4543_v61 = vpop.eup %4542 }
 0xb73   : > { %v3544_v62 = vadd.f32 %v4029_v60, %v3538_v10  ;;  %v3533_v63 = vmul.f32 %v4543_v61, %v3517_v38 }
 0xb75   : > { %3546 = vst.msk [vmem:[#allocation2] sm:$0xff] %vm504_vm2, %v3544_v62  ;;  %v3539_v1 = vmul.f32 %v3537_v5, %v3533_v63  ;;  %3551 = sbr.rel (%p4030_p5) target bundleno = 3373 (0xd2d), region = 72 }
 0xb77   : > { %v3545_v29 = vadd.f32 %v4029_v60, %v3539_v1 }
 0xb79   : > { %3547 = vst.msk [vmem:[#allocation2 + $0x8] sm:$0xff] %vm504_vm2, %v3545_v29 }
 0xb7a   : > { %v3555_v35 = vld [vmem:[%s5201_s8 + $0x18] sm:$0xff]  ;;  %v3554_v36 = vld [vmem:[%s5201_s8 + $0x10] sm:$0xff]  ;;  %4346 = vmatprep.mubr.msk.f32.mxu0 %vm504_vm2, %v3544_v62  ;;  %v3553_v4 = vld [vmem:[%s5201_s8 + $0x8] sm:$0xff]  ;;  %v4566_v39 = vmov 0.0   ;;  %vm4567_vm14 = vmmov 0   ;;  %vm3725_vm15 = vcmask 1024  }
 0xb7b   : > { %4338 = vmatprep.subr.mxu0 %v3555_v35  ;;  %v3552_v6 = vld [vmem:[%s5201_s8] sm:$0xff]  ;;  %4349 = vmatprep.subr.mxu1 %v4566_v39  ;;  %v4033_v11 = vld [vmem:[#allocation3] ss:$0 sm:$0xff] }
 0xb7c   : > { %4339 = vmatpush3.msra.mxu0 %v3555_v35  ;;  %4353 = vmatprep.mubr.msk.f32.mxu1 %vm4567_vm14, %v4566_v39  ;;  %v3637_v54 = vld [vmem:[%s5202_s9] sm:$0x3] }
 0xb7d   : > { %4340 = vmatprep.subr.mxu0 %v3554_v36 }
 0xb7e   : > { %4341 = vmatpush3.msra.mxu0 %v3554_v36 }
 0xb7f   : > { %4342 = vmatprep.subr.mxu0 %v3553_v4 }
 0xb80   : > { %4343 = vmatpush3.msra.mxu0 %v3553_v4 }
 0xb81   : > { %4344 = vmatprep.subr.mxu0 %v3552_v6 }
 0xb82   : > { %4345 = vmatpush3.msra.mxu0 %v3552_v6 }
 0xb83   : > { %4347 = vmatmul.mubr.msk.f32.vlgmr.msra.gmra.mxu0 %vm504_vm2, %v3545_v29 }
 0xc43   : > { %v4348_v30 = vpop.f32.mrf.mxu0 }
 0xc44   : > { %4350 = vmatpush3.msra.mxu1 %v4348_v30 }
 0xc45   : > { %v3628_v7 = vpop.f32.mrf.mxu0  ;;  %4351 = vmatprep.subr.mxu1 %v4566_v39 }
 0xc46   : > { %4352 = vmatpush3.msra.mxu1 %v3628_v7 }
 0xc47   : > { %4354 = vmatmul.mubr.msk.f32.vlgmr.msra.gmra.mxu1 %vm674_vm10, %v3637_v54 }
 0xd07   : > { %v3714_v31 = vpop.f32.mrf.mxu1 }
 0xd08   : > { %v3715_v8 = vadd.f32 %v4033_v11, %v3714_v31 }
 0xd09   : > { %v4355_v9 = vpop.f32.mrf.mxu1 }
 0xd0a   : > { %v4035_v12 = vmul.f32 -1.442695, %v3715_v8 }
 0xd0c   : > { %4548 = vpow2.f32 %v4035_v12 }
 0xd19   : > { %v4549_v3 = vpop.eup %4548 }
 0xd1a   : > { %v3721_v13 = vadd.f32 1.0, %v4549_v3 }
 0xd1c   : > { %4550 = vrcp.f32 %v3721_v13 }
 0xd29   : > { %v4551_v53 = vpop.eup %4550 }
 0xd2a   : > { %v3724_v15 = vmul.f32 23.0, %v4551_v53 }
 0xd2c   : > { %3726 = vst.msk [vmem:[%s5204_s11] sm:$0x3] %vm3725_vm15, %v3724_v15 }
 0xd2d PF: > { %s23_s19 = sadd.s32 1, %s4558_s19  }
 0xd2e   : > { %p20_p6 = scmp.ge.s32.totalorder %s23_s19, 8  }
 0xd30   :  { %22 = sbr.rel (!%p20_p6) target bundleno = 3 (0x3), region = 113 }

</bundles_post_ra>
